<compile_context>
chip_gen: v6e
topology: v6e:2x2x1
jax: 0.10.0
libtpu: 0.0.40
codegen_flags: <defaults>
</compile_context>

<pallas_src>
import functools

import jax
import jax.numpy as jnp
import numpy as np
from jax import lax
from jax.experimental import pallas as pl
from jax.experimental.pallas import tpu as pltpu


# ---------------------------------------------------------------------------
# Fused kernel: char LSTM (batched over words) -> tagger LSTM -> Linear -> log_softmax
# ---------------------------------------------------------------------------
def lstm_tagger_kernel(lens_ref, cx_ref, wemb_ref,
                       cwih_ref, cwhh_ref, cb_ref,
                       wih_w_ref, wih_c_ref, whh_ref, b_ref,
                       wlin_ref, blin_ref,
                       out_ref,
                       *, w_pad, max_len, ch_pad, n_hidden, seq_len):
    f32 = jnp.float32
    CH = ch_pad
    H = n_hidden

    # ---------------- char LSTM, all words as data-parallel rows -----------------
    lens = lens_ref[...]                                   # (w_pad, 1) int32
    cwhh = cwhh_ref[...]                                   # (CH, 4CH)

    # Hoisted input projection for every (t, word) pair at once: (max_len*w_pad, 4CH)
    cx_proj = (jnp.dot(cx_ref[...], cwih_ref[...], preferred_element_type=f32)
               + cb_ref[...])

    h = jnp.zeros((w_pad, CH), f32)
    c = jnp.zeros((w_pad, CH), f32)
    for t in range(max_len):                               # unrolled (static trip count)
        gates = cx_proj[t * w_pad:(t + 1) * w_pad, :] + jnp.dot(
            h, cwhh, preferred_element_type=f32)           # (w_pad, 4CH) == (8, 128)
        sig = jax.nn.sigmoid(gates)                        # 1 full-vreg EUP op
        th = jnp.tanh(gates)                               # 1 full-vreg EUP op
        i_g = sig[:, 0 * CH:1 * CH]
        f_g = sig[:, 1 * CH:2 * CH]
        g_g = th[:, 2 * CH:3 * CH]
        o_g = sig[:, 3 * CH:4 * CH]
        c_new = f_g * c + i_g * g_g
        h_new = o_g * jnp.tanh(c_new)
        valid = t < lens                                   # (w_pad, 1): freeze past word_len
        h = jnp.where(valid, h_new, h)
        c = jnp.where(valid, c_new, c)
    char_feat = h                                          # (w_pad, CH) == h_n per word

    # ---------------- tagger LSTM over the word sequence -------------------------
    # Hoisted input projection; word-emb and char-feat halves done separately so no
    # in-kernel lane concatenation is needed:  (w_pad, 4H)
    x_proj = (jnp.dot(wemb_ref[...], wih_w_ref[...], preferred_element_type=f32)
              + jnp.dot(char_feat, wih_c_ref[...], preferred_element_type=f32)
              + b_ref[...])

    whh = whh_ref[...]                                     # (H, 4H)
    h = jnp.zeros((1, H), f32)
    c = jnp.zeros((1, H), f32)
    row_ids = lax.broadcasted_iota(jnp.int32, (w_pad, H), 0)
    hs = jnp.zeros((w_pad, H), f32)                        # register-resident, no VMEM scratch
    for t in range(seq_len):                               # unrolled serial recurrence
        gates = x_proj[t:t + 1, :] + jnp.dot(h, whh, preferred_element_type=f32)  # (1, 4H)
        sig = jax.nn.sigmoid(gates)
        th = jnp.tanh(gates)
        i_g = sig[:, 0 * H:1 * H]
        f_g = sig[:, 1 * H:2 * H]
        g_g = th[:, 2 * H:3 * H]
        o_g = sig[:, 3 * H:4 * H]
        c = f_g * c + i_g * g_g
        h = o_g * jnp.tanh(c)
        hs = jnp.where(row_ids == t, h, hs)                # VPU select, replaces scratch store

    # ---------------- Linear + log_softmax, one dense (w_pad, 128) store ---------
    logits = jnp.dot(hs, wlin_ref[...], preferred_element_type=f32) + blin_ref[...]
    m = jnp.max(logits, axis=-1, keepdims=True)
    lse = m + jnp.log(jnp.sum(jnp.exp(logits - m), axis=-1, keepdims=True))
    out_ref[...] = logits - lse


# ---------------------------------------------------------------------------
# Wrapper: embedding gathers, lane/row padding glue, then one pallas_call
# ---------------------------------------------------------------------------
def _pad_gate_cols(w, hidden, hidden_pad):
    """(..., 4*hidden) -> (..., 4*hidden_pad); each i|f|g|o block zero-padded on the right."""
    if hidden_pad == hidden:
        return w
    pad_width = [(0, 0)] * (w.ndim - 1) + [(0, hidden_pad - hidden)]
    blocks = [jnp.pad(w[..., k * hidden:(k + 1) * hidden], pad_width) for k in range(4)]
    return jnp.concatenate(blocks, axis=-1)


def lstm_tagger_forward(params, word_idx, char_idx, char_lens):
    n_words, max_len = char_idx.shape
    char_dim = params["char_embedding"].shape[1]
    n_dim = params["word_embedding"].shape[1]
    char_hidden = params["char_whh"].shape[0]
    n_hidden = params["whh"].shape[0]
    n_tag = params["wlin"].shape[1]

    # Row padding (sublanes) and lane padding (full-vreg gates / lane-dense output).
    w_pad = max(8, ((n_words + 7) // 8) * 8)
    ch_pad = max(32, ((char_hidden + 31) // 32) * 32)      # 4*ch_pad multiple of 128
    t_pad = max(128, ((n_tag + 127) // 128) * 128)
    pad_w = w_pad - n_words

    char_idx_p = jnp.pad(char_idx, ((0, pad_w), (0, 0)))
    word_idx_p = jnp.pad(word_idx, (0, pad_w))
    lens_col = jnp.pad(char_lens.astype(jnp.int32), (0, pad_w)).reshape(w_pad, 1)

    # Embedding gathers (XLA glue) + layout so the char input projection is one matmul.
    # TODO(synk): could be fused via scalar-prefetch/Element gathers; kept in XLA since the
    #             gather is tiny here and the kernel stays a single launch either way.
    char_emb = jnp.take(params["char_embedding"], char_idx_p, axis=0)      # (w_pad, L, Cd)
    cx_flat = jnp.transpose(char_emb, (1, 0, 2)).reshape(max_len * w_pad, char_dim)
    word_emb = jnp.take(params["word_embedding"], word_idx_p, axis=0)      # (w_pad, n_dim)

    # Lane-align the char LSTM gates (padded hidden lanes provably stay zero).
    cwih = _pad_gate_cols(params["char_wih"], char_hidden, ch_pad)          # (Cd,  4*CHp)
    cwhh = _pad_gate_cols(params["char_whh"], char_hidden, ch_pad)
    cwhh = jnp.pad(cwhh, ((0, ch_pad - char_hidden), (0, 0)))               # (CHp, 4*CHp)
    cb = _pad_gate_cols(params["char_b"], char_hidden, ch_pad)              # (1,   4*CHp)

    # Split the stacked tagger input weight (no in-kernel concat); pad char rows to CHp.
    wih_w = params["wih"][:n_dim]                                           # (n_dim, 4H)
    wih_c = jnp.pad(params["wih"][n_dim:],
                    ((0, ch_pad - char_hidden), (0, 0)))                    # (CHp,   4H)

    # Lane-dense output: zero wlin pad columns; blin pad lanes = -1e30 so max/logsumexp
    # over the real lanes is unchanged.
    wlin = jnp.pad(params["wlin"], ((0, 0), (0, t_pad - n_tag)))
    blin = jnp.pad(params["blin"], ((0, 0), (0, t_pad - n_tag)),
                   constant_values=-1e30)

    kernel = functools.partial(
        lstm_tagger_kernel,
        w_pad=w_pad, max_len=max_len, ch_pad=ch_pad,
        n_hidden=n_hidden, seq_len=n_words)

    vmem = pl.BlockSpec(memory_space=pltpu.MemorySpace.VMEM)
    out = pl.pallas_call(
        kernel,
        out_shape=jax.ShapeDtypeStruct((w_pad, t_pad), jnp.float32),
        in_specs=[vmem] * 12,
        out_specs=vmem,
    )(lens_col, cx_flat, word_emb,
      cwih, cwhh, cb,
      wih_w, wih_c, params["whh"], params["b"],
      wlin, blin)
    return out[:n_words, :n_tag]


# ---------------------------------------------------------------------------
# Deterministic parameter init (stacked i|f|g|o gate layout, original sizes)
# ---------------------------------------------------------------------------
def init_params(key, n_word, n_char, char_dim, n_dim, char_hidden, n_hidden, n_tag):
    ks = jax.random.split(key, 10)
    s = 0.1
    return {
        "word_embedding": s * jax.random.normal(ks[0], (n_word, n_dim), jnp.float32),
        "char_embedding": s * jax.random.normal(ks[1], (n_char, char_dim), jnp.float32),
        "char_wih": s * jax.random.normal(ks[2], (char_dim, 4 * char_hidden), jnp.float32),
        "char_whh": s * jax.random.normal(ks[3], (char_hidden, 4 * char_hidden), jnp.float32),
        "char_b":   s * jax.random.normal(ks[4], (1, 4 * char_hidden), jnp.float32),
        "wih":  s * jax.random.normal(ks[5], (n_dim + char_hidden, 4 * n_hidden), jnp.float32),
        "whh":  s * jax.random.normal(ks[6], (n_hidden, 4 * n_hidden), jnp.float32),
        "b":    s * jax.random.normal(ks[7], (1, 4 * n_hidden), jnp.float32),
        "wlin": s * jax.random.normal(ks[8], (n_hidden, n_tag), jnp.float32),
        "blin": s * jax.random.normal(ks[9], (1, n_tag), jnp.float32),
    }


# ---------------------------------------------------------------------------
# Pure-JAX reference (same stacked-gate parameterization) for correctness check
# ---------------------------------------------------------------------------
def _ref_cell(x_t, h, c, wih, whh, b, hidden):
    gates = x_t @ wih + h @ whh + b
    i = jax.nn.sigmoid(gates[:, 0 * hidden:1 * hidden])
    f = jax.nn.sigmoid(gates[:, 1 * hidden:2 * hidden])
    g = jnp.tanh(gates[:, 2 * hidden:3 * hidden])
    o = jax.nn.sigmoid(gates[:, 3 * hidden:4 * hidden])
    c = f * c + i * g
    h = o * jnp.tanh(c)
    return h, c


def ref_forward(params, word_idx, char_idx, char_lens):
    n_words = char_idx.shape[0]
    CH = params["char_whh"].shape[0]
    H = params["whh"].shape[0]
    ce = params["char_embedding"][char_idx]
    feats = []
    for w in range(n_words):
        h = jnp.zeros((1, CH)); c = jnp.zeros((1, CH))
        for t in range(int(char_lens[w])):
            h, c = _ref_cell(ce[w, t][None, :], h, c,
                             params["char_wih"], params["char_whh"], params["char_b"], CH)
        feats.append(h)
    char_feat = jnp.concatenate(feats, 0)
    x = jnp.concatenate([params["word_embedding"][word_idx], char_feat], 1)
    h = jnp.zeros((1, H)); c = jnp.zeros((1, H))
    outs = []
    for t in range(x.shape[0]):
        h, c = _ref_cell(x[t][None, :], h, c, params["wih"], params["whh"], params["b"], H)
        outs.append(h)
    hs = jnp.concatenate(outs, 0)
    logits = hs @ params["wlin"] + params["blin"]
    return jax.nn.log_softmax(logits, axis=1)


if __name__ == "__main__":
    # Small config: vocab 20 words / 30 chars, char_dim 8, word_dim 16,
    # char_hidden 16, n_hidden 32, n_tag 8, sentence of 5 words, max word len 6.
    n_word, n_char = 20, 30
    char_dim, n_dim = 8, 16
    char_hidden, n_hidden, n_tag = 16, 32, 8
    seq_len, max_word_len = 5, 6

    key = jax.random.PRNGKey(0)
    kp, kw, kc, kl = jax.random.split(key, 4)
    params = init_params(kp, n_word, n_char, char_dim, n_dim,
                         char_hidden, n_hidden, n_tag)

    word_idx = jax.random.randint(kw, (seq_len,), 0, n_word, dtype=jnp.int32)
    char_idx = jax.random.randint(kc, (seq_len, max_word_len), 0, n_char, dtype=jnp.int32)
    char_lens = jax.random.randint(kl, (seq_len,), 1, max_word_len + 1, dtype=jnp.int32)

    y = lstm_tagger_forward(params, word_idx, char_idx, char_lens)
    y = jax.block_until_ready(y)

    y_ref = ref_forward(params, np.array(word_idx), np.array(char_idx), np.array(char_lens))
    np.testing.assert_allclose(np.array(y), np.array(y_ref), atol=5e-3, rtol=5e-3)

    print("KERNEL_OK")
</pallas_src>

<mosaic_0001>
module attributes {stable_mosaic.version = 11 : i64} {
  func.func @lstm_tagger_kernel(%arg0: memref<8x1xi32, #tpu.memory_space<vmem>>, %arg1: memref<48x8xf32, #tpu.memory_space<vmem>>, %arg2: memref<8x16xf32, #tpu.memory_space<vmem>>, %arg3: memref<8x128xf32, #tpu.memory_space<vmem>>, %arg4: memref<32x128xf32, #tpu.memory_space<vmem>>, %arg5: memref<1x128xf32, #tpu.memory_space<vmem>>, %arg6: memref<16x128xf32, #tpu.memory_space<vmem>>, %arg7: memref<32x128xf32, #tpu.memory_space<vmem>>, %arg8: memref<32x128xf32, #tpu.memory_space<vmem>>, %arg9: memref<1x128xf32, #tpu.memory_space<vmem>>, %arg10: memref<32x128xf32, #tpu.memory_space<vmem>>, %arg11: memref<1x128xf32, #tpu.memory_space<vmem>>, %arg12: memref<8x128xf32, #tpu.memory_space<vmem>>) attributes {dimension_semantics = [], scalar_prefetch = 0 : i64, scratch_operands = 0 : i64, tpu.core_type = #tpu.core_type<tc>} {
    %c0 = arith.constant 0 : index
    %c0_0 = arith.constant 0 : index
    %0 = vector.load %arg0[%c0, %c0_0] : memref<8x1xi32, #tpu.memory_space<vmem>>, vector<8x1xi32>
    %c0_1 = arith.constant 0 : index
    %c0_2 = arith.constant 0 : index
    %1 = vector.load %arg4[%c0_1, %c0_2] : memref<32x128xf32, #tpu.memory_space<vmem>>, vector<32x128xf32>
    %c0_3 = arith.constant 0 : index
    %c0_4 = arith.constant 0 : index
    %2 = vector.load %arg1[%c0_3, %c0_4] : memref<48x8xf32, #tpu.memory_space<vmem>>, vector<48x8xf32>
    %c0_5 = arith.constant 0 : index
    %c0_6 = arith.constant 0 : index
    %3 = vector.load %arg3[%c0_5, %c0_6] : memref<8x128xf32, #tpu.memory_space<vmem>>, vector<8x128xf32>
    %cst = arith.constant dense<0.000000e+00> : vector<48x128xf32>
    %4 = tpu.matmul %2, %3, %cst {dimension_numbers = #tpu.dot_dimension_numbers<[1], [0], [0], [1], [0, 0, 1, 1], [], []>} : vector<48x8xf32>, vector<8x128xf32>, vector<48x128xf32> -> vector<48x128xf32>
    %c0_7 = arith.constant 0 : index
    %c0_8 = arith.constant 0 : index
    %5 = vector.load %arg5[%c0_7, %c0_8] : memref<1x128xf32, #tpu.memory_space<vmem>>, vector<1x128xf32>
    %6 = vector.broadcast %5 : vector<1x128xf32> to vector<48x128xf32>
    %7 = arith.addf %4, %6 : vector<48x128xf32>
    %cst_9 = arith.constant 0.000000e+00 : f32
    %8 = vector.broadcast %cst_9 : f32 to vector<8x32xf32>
    %cst_10 = arith.constant 0.000000e+00 : f32
    %9 = vector.broadcast %cst_10 : f32 to vector<8x32xf32>
    %10 = vector.extract_strided_slice %7 {offsets = [0, 0], sizes = [8, 128], strides = [1, 1]} : vector<48x128xf32> to vector<8x128xf32>
    %cst_11 = arith.constant dense<0.000000e+00> : vector<8x128xf32>
    %11 = tpu.matmul %8, %1, %cst_11 {dimension_numbers = #tpu.dot_dimension_numbers<[1], [0], [0], [1], [0, 0, 1, 1], [], []>} : vector<8x32xf32>, vector<32x128xf32>, vector<8x128xf32> -> vector<8x128xf32>
    %12 = arith.addf %10, %11 : vector<8x128xf32>
    %13 = arith.negf %12 : vector<8x128xf32>
    %14 = math.exp %13 : vector<8x128xf32>
    %cst_12 = arith.constant 1.000000e+00 : f32
    %15 = vector.broadcast %cst_12 : f32 to vector<8x128xf32>
    %16 = arith.addf %15, %14 : vector<8x128xf32>
    %17 = arith.divf %15, %16 : vector<8x128xf32>
    %18 = math.tanh %12 : vector<8x128xf32>
    %19 = vector.extract_strided_slice %17 {offsets = [0, 0], sizes = [8, 32], strides = [1, 1]} : vector<8x128xf32> to vector<8x32xf32>
    %20 = vector.extract_strided_slice %17 {offsets = [0, 32], sizes = [8, 32], strides = [1, 1]} : vector<8x128xf32> to vector<8x32xf32>
    %21 = vector.extract_strided_slice %18 {offsets = [0, 64], sizes = [8, 32], strides = [1, 1]} : vector<8x128xf32> to vector<8x32xf32>
    %22 = vector.extract_strided_slice %17 {offsets = [0, 96], sizes = [8, 32], strides = [1, 1]} : vector<8x128xf32> to vector<8x32xf32>
    %23 = arith.mulf %20, %9 : vector<8x32xf32>
    %24 = arith.mulf %19, %21 : vector<8x32xf32>
    %25 = arith.addf %23, %24 : vector<8x32xf32>
    %26 = math.tanh %25 : vector<8x32xf32>
    %27 = arith.mulf %22, %26 : vector<8x32xf32>
    %c0_i32 = arith.constant 0 : i32
    %28 = vector.broadcast %c0_i32 : i32 to vector<8x1xi32>
    %29 = arith.cmpi sgt, %0, %28 : vector<8x1xi32>
    %30 = vector.shape_cast %29 : vector<8x1xi1> to vector<8x1xi1>
    %31 = vector.broadcast %30 : vector<8x1xi1> to vector<8x32xi1>
    %32 = arith.select %31, %27, %8 : vector<8x32xi1>, vector<8x32xf32>
    %33 = vector.shape_cast %29 : vector<8x1xi1> to vector<8x1xi1>
    %34 = vector.broadcast %33 : vector<8x1xi1> to vector<8x32xi1>
    %35 = arith.select %34, %25, %9 : vector<8x32xi1>, vector<8x32xf32>
    %36 = vector.extract_strided_slice %7 {offsets = [8, 0], sizes = [8, 128], strides = [1, 1]} : vector<48x128xf32> to vector<8x128xf32>
    %cst_13 = arith.constant dense<0.000000e+00> : vector<8x128xf32>
    %37 = tpu.matmul %32, %1, %cst_13 {dimension_numbers = #tpu.dot_dimension_numbers<[1], [0], [0], [1], [0, 0, 1, 1], [], []>} : vector<8x32xf32>, vector<32x128xf32>, vector<8x128xf32> -> vector<8x128xf32>
    %38 = arith.addf %36, %37 : vector<8x128xf32>
    %39 = arith.negf %38 : vector<8x128xf32>
    %40 = math.exp %39 : vector<8x128xf32>
    %cst_14 = arith.constant 1.000000e+00 : f32
    %41 = vector.broadcast %cst_14 : f32 to vector<8x128xf32>
    %42 = arith.addf %41, %40 : vector<8x128xf32>
    %43 = arith.divf %41, %42 : vector<8x128xf32>
    %44 = math.tanh %38 : vector<8x128xf32>
    %45 = vector.extract_strided_slice %43 {offsets = [0, 0], sizes = [8, 32], strides = [1, 1]} : vector<8x128xf32> to vector<8x32xf32>
    %46 = vector.extract_strided_slice %43 {offsets = [0, 32], sizes = [8, 32], strides = [1, 1]} : vector<8x128xf32> to vector<8x32xf32>
    %47 = vector.extract_strided_slice %44 {offsets = [0, 64], sizes = [8, 32], strides = [1, 1]} : vector<8x128xf32> to vector<8x32xf32>
    %48 = vector.extract_strided_slice %43 {offsets = [0, 96], sizes = [8, 32], strides = [1, 1]} : vector<8x128xf32> to vector<8x32xf32>
    %49 = arith.mulf %46, %35 : vector<8x32xf32>
    %50 = arith.mulf %45, %47 : vector<8x32xf32>
    %51 = arith.addf %49, %50 : vector<8x32xf32>
    %52 = math.tanh %51 : vector<8x32xf32>
    %53 = arith.mulf %48, %52 : vector<8x32xf32>
    %c1_i32 = arith.constant 1 : i32
    %54 = vector.broadcast %c1_i32 : i32 to vector<8x1xi32>
    %55 = arith.cmpi sgt, %0, %54 : vector<8x1xi32>
    %56 = vector.shape_cast %55 : vector<8x1xi1> to vector<8x1xi1>
    %57 = vector.broadcast %56 : vector<8x1xi1> to vector<8x32xi1>
    %58 = arith.select %57, %53, %32 : vector<8x32xi1>, vector<8x32xf32>
    %59 = vector.shape_cast %55 : vector<8x1xi1> to vector<8x1xi1>
    %60 = vector.broadcast %59 : vector<8x1xi1> to vector<8x32xi1>
    %61 = arith.select %60, %51, %35 : vector<8x32xi1>, vector<8x32xf32>
    %62 = vector.extract_strided_slice %7 {offsets = [16, 0], sizes = [8, 128], strides = [1, 1]} : vector<48x128xf32> to vector<8x128xf32>
    %cst_15 = arith.constant dense<0.000000e+00> : vector<8x128xf32>
    %63 = tpu.matmul %58, %1, %cst_15 {dimension_numbers = #tpu.dot_dimension_numbers<[1], [0], [0], [1], [0, 0, 1, 1], [], []>} : vector<8x32xf32>, vector<32x128xf32>, vector<8x128xf32> -> vector<8x128xf32>
    %64 = arith.addf %62, %63 : vector<8x128xf32>
    %65 = arith.negf %64 : vector<8x128xf32>
    %66 = math.exp %65 : vector<8x128xf32>
    %cst_16 = arith.constant 1.000000e+00 : f32
    %67 = vector.broadcast %cst_16 : f32 to vector<8x128xf32>
    %68 = arith.addf %67, %66 : vector<8x128xf32>
    %69 = arith.divf %67, %68 : vector<8x128xf32>
    %70 = math.tanh %64 : vector<8x128xf32>
    %71 = vector.extract_strided_slice %69 {offsets = [0, 0], sizes = [8, 32], strides = [1, 1]} : vector<8x128xf32> to vector<8x32xf32>
    %72 = vector.extract_strided_slice %69 {offsets = [0, 32], sizes = [8, 32], strides = [1, 1]} : vector<8x128xf32> to vector<8x32xf32>
    %73 = vector.extract_strided_slice %70 {offsets = [0, 64], sizes = [8, 32], strides = [1, 1]} : vector<8x128xf32> to vector<8x32xf32>
    %74 = vector.extract_strided_slice %69 {offsets = [0, 96], sizes = [8, 32], strides = [1, 1]} : vector<8x128xf32> to vector<8x32xf32>
    %75 = arith.mulf %72, %61 : vector<8x32xf32>
    %76 = arith.mulf %71, %73 : vector<8x32xf32>
    %77 = arith.addf %75, %76 : vector<8x32xf32>
    %78 = math.tanh %77 : vector<8x32xf32>
    %79 = arith.mulf %74, %78 : vector<8x32xf32>
    %c2_i32 = arith.constant 2 : i32
    %80 = vector.broadcast %c2_i32 : i32 to vector<8x1xi32>
    %81 = arith.cmpi sgt, %0, %80 : vector<8x1xi32>
    %82 = vector.shape_cast %81 : vector<8x1xi1> to vector<8x1xi1>
    %83 = vector.broadcast %82 : vector<8x1xi1> to vector<8x32xi1>
    %84 = arith.select %83, %79, %58 : vector<8x32xi1>, vector<8x32xf32>
    %85 = vector.shape_cast %81 : vector<8x1xi1> to vector<8x1xi1>
    %86 = vector.broadcast %85 : vector<8x1xi1> to vector<8x32xi1>
    %87 = arith.select %86, %77, %61 : vector<8x32xi1>, vector<8x32xf32>
    %88 = vector.extract_strided_slice %7 {offsets = [24, 0], sizes = [8, 128], strides = [1, 1]} : vector<48x128xf32> to vector<8x128xf32>
    %cst_17 = arith.constant dense<0.000000e+00> : vector<8x128xf32>
    %89 = tpu.matmul %84, %1, %cst_17 {dimension_numbers = #tpu.dot_dimension_numbers<[1], [0], [0], [1], [0, 0, 1, 1], [], []>} : vector<8x32xf32>, vector<32x128xf32>, vector<8x128xf32> -> vector<8x128xf32>
    %90 = arith.addf %88, %89 : vector<8x128xf32>
    %91 = arith.negf %90 : vector<8x128xf32>
    %92 = math.exp %91 : vector<8x128xf32>
    %cst_18 = arith.constant 1.000000e+00 : f32
    %93 = vector.broadcast %cst_18 : f32 to vector<8x128xf32>
    %94 = arith.addf %93, %92 : vector<8x128xf32>
    %95 = arith.divf %93, %94 : vector<8x128xf32>
    %96 = math.tanh %90 : vector<8x128xf32>
    %97 = vector.extract_strided_slice %95 {offsets = [0, 0], sizes = [8, 32], strides = [1, 1]} : vector<8x128xf32> to vector<8x32xf32>
    %98 = vector.extract_strided_slice %95 {offsets = [0, 32], sizes = [8, 32], strides = [1, 1]} : vector<8x128xf32> to vector<8x32xf32>
    %99 = vector.extract_strided_slice %96 {offsets = [0, 64], sizes = [8, 32], strides = [1, 1]} : vector<8x128xf32> to vector<8x32xf32>
    %100 = vector.extract_strided_slice %95 {offsets = [0, 96], sizes = [8, 32], strides = [1, 1]} : vector<8x128xf32> to vector<8x32xf32>
    %101 = arith.mulf %98, %87 : vector<8x32xf32>
    %102 = arith.mulf %97, %99 : vector<8x32xf32>
    %103 = arith.addf %101, %102 : vector<8x32xf32>
    %104 = math.tanh %103 : vector<8x32xf32>
    %105 = arith.mulf %100, %104 : vector<8x32xf32>
    %c3_i32 = arith.constant 3 : i32
    %106 = vector.broadcast %c3_i32 : i32 to vector<8x1xi32>
    %107 = arith.cmpi sgt, %0, %106 : vector<8x1xi32>
    %108 = vector.shape_cast %107 : vector<8x1xi1> to vector<8x1xi1>
    %109 = vector.broadcast %108 : vector<8x1xi1> to vector<8x32xi1>
    %110 = arith.select %109, %105, %84 : vector<8x32xi1>, vector<8x32xf32>
    %111 = vector.shape_cast %107 : vector<8x1xi1> to vector<8x1xi1>
    %112 = vector.broadcast %111 : vector<8x1xi1> to vector<8x32xi1>
    %113 = arith.select %112, %103, %87 : vector<8x32xi1>, vector<8x32xf32>
    %114 = vector.extract_strided_slice %7 {offsets = [32, 0], sizes = [8, 128], strides = [1, 1]} : vector<48x128xf32> to vector<8x128xf32>
    %cst_19 = arith.constant dense<0.000000e+00> : vector<8x128xf32>
    %115 = tpu.matmul %110, %1, %cst_19 {dimension_numbers = #tpu.dot_dimension_numbers<[1], [0], [0], [1], [0, 0, 1, 1], [], []>} : vector<8x32xf32>, vector<32x128xf32>, vector<8x128xf32> -> vector<8x128xf32>
    %116 = arith.addf %114, %115 : vector<8x128xf32>
    %117 = arith.negf %116 : vector<8x128xf32>
    %118 = math.exp %117 : vector<8x128xf32>
    %cst_20 = arith.constant 1.000000e+00 : f32
    %119 = vector.broadcast %cst_20 : f32 to vector<8x128xf32>
    %120 = arith.addf %119, %118 : vector<8x128xf32>
    %121 = arith.divf %119, %120 : vector<8x128xf32>
    %122 = math.tanh %116 : vector<8x128xf32>
    %123 = vector.extract_strided_slice %121 {offsets = [0, 0], sizes = [8, 32], strides = [1, 1]} : vector<8x128xf32> to vector<8x32xf32>
    %124 = vector.extract_strided_slice %121 {offsets = [0, 32], sizes = [8, 32], strides = [1, 1]} : vector<8x128xf32> to vector<8x32xf32>
    %125 = vector.extract_strided_slice %122 {offsets = [0, 64], sizes = [8, 32], strides = [1, 1]} : vector<8x128xf32> to vector<8x32xf32>
    %126 = vector.extract_strided_slice %121 {offsets = [0, 96], sizes = [8, 32], strides = [1, 1]} : vector<8x128xf32> to vector<8x32xf32>
    %127 = arith.mulf %124, %113 : vector<8x32xf32>
    %128 = arith.mulf %123, %125 : vector<8x32xf32>
    %129 = arith.addf %127, %128 : vector<8x32xf32>
    %130 = math.tanh %129 : vector<8x32xf32>
    %131 = arith.mulf %126, %130 : vector<8x32xf32>
    %c4_i32 = arith.constant 4 : i32
    %132 = vector.broadcast %c4_i32 : i32 to vector<8x1xi32>
    %133 = arith.cmpi sgt, %0, %132 : vector<8x1xi32>
    %134 = vector.shape_cast %133 : vector<8x1xi1> to vector<8x1xi1>
    %135 = vector.broadcast %134 : vector<8x1xi1> to vector<8x32xi1>
    %136 = arith.select %135, %131, %110 : vector<8x32xi1>, vector<8x32xf32>
    %137 = vector.shape_cast %133 : vector<8x1xi1> to vector<8x1xi1>
    %138 = vector.broadcast %137 : vector<8x1xi1> to vector<8x32xi1>
    %139 = arith.select %138, %129, %113 : vector<8x32xi1>, vector<8x32xf32>
    %140 = vector.extract_strided_slice %7 {offsets = [40, 0], sizes = [8, 128], strides = [1, 1]} : vector<48x128xf32> to vector<8x128xf32>
    %cst_21 = arith.constant dense<0.000000e+00> : vector<8x128xf32>
    %141 = tpu.matmul %136, %1, %cst_21 {dimension_numbers = #tpu.dot_dimension_numbers<[1], [0], [0], [1], [0, 0, 1, 1], [], []>} : vector<8x32xf32>, vector<32x128xf32>, vector<8x128xf32> -> vector<8x128xf32>
    %142 = arith.addf %140, %141 : vector<8x128xf32>
    %143 = arith.negf %142 : vector<8x128xf32>
    %144 = math.exp %143 : vector<8x128xf32>
    %cst_22 = arith.constant 1.000000e+00 : f32
    %145 = vector.broadcast %cst_22 : f32 to vector<8x128xf32>
    %146 = arith.addf %145, %144 : vector<8x128xf32>
    %147 = arith.divf %145, %146 : vector<8x128xf32>
    %148 = math.tanh %142 : vector<8x128xf32>
    %149 = vector.extract_strided_slice %147 {offsets = [0, 0], sizes = [8, 32], strides = [1, 1]} : vector<8x128xf32> to vector<8x32xf32>
    %150 = vector.extract_strided_slice %147 {offsets = [0, 32], sizes = [8, 32], strides = [1, 1]} : vector<8x128xf32> to vector<8x32xf32>
    %151 = vector.extract_strided_slice %148 {offsets = [0, 64], sizes = [8, 32], strides = [1, 1]} : vector<8x128xf32> to vector<8x32xf32>
    %152 = vector.extract_strided_slice %147 {offsets = [0, 96], sizes = [8, 32], strides = [1, 1]} : vector<8x128xf32> to vector<8x32xf32>
    %153 = arith.mulf %150, %139 : vector<8x32xf32>
    %154 = arith.mulf %149, %151 : vector<8x32xf32>
    %155 = arith.addf %153, %154 : vector<8x32xf32>
    %156 = math.tanh %155 : vector<8x32xf32>
    %157 = arith.mulf %152, %156 : vector<8x32xf32>
    %c5_i32 = arith.constant 5 : i32
    %158 = vector.broadcast %c5_i32 : i32 to vector<8x1xi32>
    %159 = arith.cmpi sgt, %0, %158 : vector<8x1xi32>
    %160 = vector.shape_cast %159 : vector<8x1xi1> to vector<8x1xi1>
    %161 = vector.broadcast %160 : vector<8x1xi1> to vector<8x32xi1>
    %162 = arith.select %161, %157, %136 : vector<8x32xi1>, vector<8x32xf32>
    %c0_23 = arith.constant 0 : index
    %c0_24 = arith.constant 0 : index
    %163 = vector.load %arg2[%c0_23, %c0_24] : memref<8x16xf32, #tpu.memory_space<vmem>>, vector<8x16xf32>
    %c0_25 = arith.constant 0 : index
    %c0_26 = arith.constant 0 : index
    %164 = vector.load %arg6[%c0_25, %c0_26] : memref<16x128xf32, #tpu.memory_space<vmem>>, vector<16x128xf32>
    %cst_27 = arith.constant dense<0.000000e+00> : vector<8x128xf32>
    %165 = tpu.matmul %163, %164, %cst_27 {dimension_numbers = #tpu.dot_dimension_numbers<[1], [0], [0], [1], [0, 0, 1, 1], [], []>} : vector<8x16xf32>, vector<16x128xf32>, vector<8x128xf32> -> vector<8x128xf32>
    %c0_28 = arith.constant 0 : index
    %c0_29 = arith.constant 0 : index
    %166 = vector.load %arg7[%c0_28, %c0_29] : memref<32x128xf32, #tpu.memory_space<vmem>>, vector<32x128xf32>
    %cst_30 = arith.constant dense<0.000000e+00> : vector<8x128xf32>
    %167 = tpu.matmul %162, %166, %cst_30 {dimension_numbers = #tpu.dot_dimension_numbers<[1], [0], [0], [1], [0, 0, 1, 1], [], []>} : vector<8x32xf32>, vector<32x128xf32>, vector<8x128xf32> -> vector<8x128xf32>
    %168 = arith.addf %165, %167 : vector<8x128xf32>
    %c0_31 = arith.constant 0 : index
    %c0_32 = arith.constant 0 : index
    %169 = vector.load %arg9[%c0_31, %c0_32] : memref<1x128xf32, #tpu.memory_space<vmem>>, vector<1x128xf32>
    %170 = vector.broadcast %169 : vector<1x128xf32> to vector<8x128xf32>
    %171 = arith.addf %168, %170 : vector<8x128xf32>
    %c0_33 = arith.constant 0 : index
    %c0_34 = arith.constant 0 : index
    %172 = vector.load %arg8[%c0_33, %c0_34] : memref<32x128xf32, #tpu.memory_space<vmem>>, vector<32x128xf32>
    %cst_35 = arith.constant 0.000000e+00 : f32
    %173 = vector.broadcast %cst_35 : f32 to vector<1x32xf32>
    %cst_36 = arith.constant 0.000000e+00 : f32
    %174 = vector.broadcast %cst_36 : f32 to vector<1x32xf32>
    %175 = tpu.iota {dimensions = array<i32: 0>} : vector<8x32xi32>
    %cst_37 = arith.constant 0.000000e+00 : f32
    %176 = vector.broadcast %cst_37 : f32 to vector<8x32xf32>
    %177 = vector.extract_strided_slice %171 {offsets = [0, 0], sizes = [1, 128], strides = [1, 1]} : vector<8x128xf32> to vector<1x128xf32>
    %cst_38 = arith.constant dense<0.000000e+00> : vector<1x128xf32>
    %178 = tpu.matmul %173, %172, %cst_38 {dimension_numbers = #tpu.dot_dimension_numbers<[1], [0], [0], [1], [0, 0, 1, 1], [], []>} : vector<1x32xf32>, vector<32x128xf32>, vector<1x128xf32> -> vector<1x128xf32>
    %179 = arith.addf %177, %178 : vector<1x128xf32>
    %180 = arith.negf %179 : vector<1x128xf32>
    %181 = math.exp %180 : vector<1x128xf32>
    %cst_39 = arith.constant 1.000000e+00 : f32
    %182 = vector.broadcast %cst_39 : f32 to vector<1x128xf32>
    %183 = arith.addf %182, %181 : vector<1x128xf32>
    %184 = arith.divf %182, %183 : vector<1x128xf32>
    %185 = math.tanh %179 : vector<1x128xf32>
    %186 = vector.extract_strided_slice %184 {offsets = [0, 0], sizes = [1, 32], strides = [1, 1]} : vector<1x128xf32> to vector<1x32xf32>
    %187 = vector.extract_strided_slice %184 {offsets = [0, 32], sizes = [1, 32], strides = [1, 1]} : vector<1x128xf32> to vector<1x32xf32>
    %188 = vector.extract_strided_slice %185 {offsets = [0, 64], sizes = [1, 32], strides = [1, 1]} : vector<1x128xf32> to vector<1x32xf32>
    %189 = vector.extract_strided_slice %184 {offsets = [0, 96], sizes = [1, 32], strides = [1, 1]} : vector<1x128xf32> to vector<1x32xf32>
    %190 = arith.mulf %187, %174 : vector<1x32xf32>
    %191 = arith.mulf %186, %188 : vector<1x32xf32>
    %192 = arith.addf %190, %191 : vector<1x32xf32>
    %193 = math.tanh %192 : vector<1x32xf32>
    %194 = arith.mulf %189, %193 : vector<1x32xf32>
    %c0_i32_40 = arith.constant 0 : i32
    %195 = vector.broadcast %c0_i32_40 : i32 to vector<8x32xi32>
    %196 = arith.cmpi eq, %175, %195 : vector<8x32xi32>
    %197 = vector.shape_cast %194 : vector<1x32xf32> to vector<1x32xf32>
    %198 = vector.broadcast %197 : vector<1x32xf32> to vector<8x32xf32>
    %199 = arith.select %196, %198, %176 : vector<8x32xi1>, vector<8x32xf32>
    %200 = vector.extract_strided_slice %171 {offsets = [1, 0], sizes = [1, 128], strides = [1, 1]} : vector<8x128xf32> to vector<1x128xf32>
    %cst_41 = arith.constant dense<0.000000e+00> : vector<1x128xf32>
    %201 = tpu.matmul %194, %172, %cst_41 {dimension_numbers = #tpu.dot_dimension_numbers<[1], [0], [0], [1], [0, 0, 1, 1], [], []>} : vector<1x32xf32>, vector<32x128xf32>, vector<1x128xf32> -> vector<1x128xf32>
    %202 = arith.addf %200, %201 : vector<1x128xf32>
    %203 = arith.negf %202 : vector<1x128xf32>
    %204 = math.exp %203 : vector<1x128xf32>
    %cst_42 = arith.constant 1.000000e+00 : f32
    %205 = vector.broadcast %cst_42 : f32 to vector<1x128xf32>
    %206 = arith.addf %205, %204 : vector<1x128xf32>
    %207 = arith.divf %205, %206 : vector<1x128xf32>
    %208 = math.tanh %202 : vector<1x128xf32>
    %209 = vector.extract_strided_slice %207 {offsets = [0, 0], sizes = [1, 32], strides = [1, 1]} : vector<1x128xf32> to vector<1x32xf32>
    %210 = vector.extract_strided_slice %207 {offsets = [0, 32], sizes = [1, 32], strides = [1, 1]} : vector<1x128xf32> to vector<1x32xf32>
    %211 = vector.extract_strided_slice %208 {offsets = [0, 64], sizes = [1, 32], strides = [1, 1]} : vector<1x128xf32> to vector<1x32xf32>
    %212 = vector.extract_strided_slice %207 {offsets = [0, 96], sizes = [1, 32], strides = [1, 1]} : vector<1x128xf32> to vector<1x32xf32>
    %213 = arith.mulf %210, %192 : vector<1x32xf32>
    %214 = arith.mulf %209, %211 : vector<1x32xf32>
    %215 = arith.addf %213, %214 : vector<1x32xf32>
    %216 = math.tanh %215 : vector<1x32xf32>
    %217 = arith.mulf %212, %216 : vector<1x32xf32>
    %c1_i32_43 = arith.constant 1 : i32
    %218 = vector.broadcast %c1_i32_43 : i32 to vector<8x32xi32>
    %219 = arith.cmpi eq, %175, %218 : vector<8x32xi32>
    %220 = vector.shape_cast %217 : vector<1x32xf32> to vector<1x32xf32>
    %221 = vector.broadcast %220 : vector<1x32xf32> to vector<8x32xf32>
    %222 = arith.select %219, %221, %199 : vector<8x32xi1>, vector<8x32xf32>
    %223 = vector.extract_strided_slice %171 {offsets = [2, 0], sizes = [1, 128], strides = [1, 1]} : vector<8x128xf32> to vector<1x128xf32>
    %cst_44 = arith.constant dense<0.000000e+00> : vector<1x128xf32>
    %224 = tpu.matmul %217, %172, %cst_44 {dimension_numbers = #tpu.dot_dimension_numbers<[1], [0], [0], [1], [0, 0, 1, 1], [], []>} : vector<1x32xf32>, vector<32x128xf32>, vector<1x128xf32> -> vector<1x128xf32>
    %225 = arith.addf %223, %224 : vector<1x128xf32>
    %226 = arith.negf %225 : vector<1x128xf32>
    %227 = math.exp %226 : vector<1x128xf32>
    %cst_45 = arith.constant 1.000000e+00 : f32
    %228 = vector.broadcast %cst_45 : f32 to vector<1x128xf32>
    %229 = arith.addf %228, %227 : vector<1x128xf32>
    %230 = arith.divf %228, %229 : vector<1x128xf32>
    %231 = math.tanh %225 : vector<1x128xf32>
    %232 = vector.extract_strided_slice %230 {offsets = [0, 0], sizes = [1, 32], strides = [1, 1]} : vector<1x128xf32> to vector<1x32xf32>
    %233 = vector.extract_strided_slice %230 {offsets = [0, 32], sizes = [1, 32], strides = [1, 1]} : vector<1x128xf32> to vector<1x32xf32>
    %234 = vector.extract_strided_slice %231 {offsets = [0, 64], sizes = [1, 32], strides = [1, 1]} : vector<1x128xf32> to vector<1x32xf32>
    %235 = vector.extract_strided_slice %230 {offsets = [0, 96], sizes = [1, 32], strides = [1, 1]} : vector<1x128xf32> to vector<1x32xf32>
    %236 = arith.mulf %233, %215 : vector<1x32xf32>
    %237 = arith.mulf %232, %234 : vector<1x32xf32>
    %238 = arith.addf %236, %237 : vector<1x32xf32>
    %239 = math.tanh %238 : vector<1x32xf32>
    %240 = arith.mulf %235, %239 : vector<1x32xf32>
    %c2_i32_46 = arith.constant 2 : i32
    %241 = vector.broadcast %c2_i32_46 : i32 to vector<8x32xi32>
    %242 = arith.cmpi eq, %175, %241 : vector<8x32xi32>
    %243 = vector.shape_cast %240 : vector<1x32xf32> to vector<1x32xf32>
    %244 = vector.broadcast %243 : vector<1x32xf32> to vector<8x32xf32>
    %245 = arith.select %242, %244, %222 : vector<8x32xi1>, vector<8x32xf32>
    %246 = vector.extract_strided_slice %171 {offsets = [3, 0], sizes = [1, 128], strides = [1, 1]} : vector<8x128xf32> to vector<1x128xf32>
    %cst_47 = arith.constant dense<0.000000e+00> : vector<1x128xf32>
    %247 = tpu.matmul %240, %172, %cst_47 {dimension_numbers = #tpu.dot_dimension_numbers<[1], [0], [0], [1], [0, 0, 1, 1], [], []>} : vector<1x32xf32>, vector<32x128xf32>, vector<1x128xf32> -> vector<1x128xf32>
    %248 = arith.addf %246, %247 : vector<1x128xf32>
    %249 = arith.negf %248 : vector<1x128xf32>
    %250 = math.exp %249 : vector<1x128xf32>
    %cst_48 = arith.constant 1.000000e+00 : f32
    %251 = vector.broadcast %cst_48 : f32 to vector<1x128xf32>
    %252 = arith.addf %251, %250 : vector<1x128xf32>
    %253 = arith.divf %251, %252 : vector<1x128xf32>
    %254 = math.tanh %248 : vector<1x128xf32>
    %255 = vector.extract_strided_slice %253 {offsets = [0, 0], sizes = [1, 32], strides = [1, 1]} : vector<1x128xf32> to vector<1x32xf32>
    %256 = vector.extract_strided_slice %253 {offsets = [0, 32], sizes = [1, 32], strides = [1, 1]} : vector<1x128xf32> to vector<1x32xf32>
    %257 = vector.extract_strided_slice %254 {offsets = [0, 64], sizes = [1, 32], strides = [1, 1]} : vector<1x128xf32> to vector<1x32xf32>
    %258 = vector.extract_strided_slice %253 {offsets = [0, 96], sizes = [1, 32], strides = [1, 1]} : vector<1x128xf32> to vector<1x32xf32>
    %259 = arith.mulf %256, %238 : vector<1x32xf32>
    %260 = arith.mulf %255, %257 : vector<1x32xf32>
    %261 = arith.addf %259, %260 : vector<1x32xf32>
    %262 = math.tanh %261 : vector<1x32xf32>
    %263 = arith.mulf %258, %262 : vector<1x32xf32>
    %c3_i32_49 = arith.constant 3 : i32
    %264 = vector.broadcast %c3_i32_49 : i32 to vector<8x32xi32>
    %265 = arith.cmpi eq, %175, %264 : vector<8x32xi32>
    %266 = vector.shape_cast %263 : vector<1x32xf32> to vector<1x32xf32>
    %267 = vector.broadcast %266 : vector<1x32xf32> to vector<8x32xf32>
    %268 = arith.select %265, %267, %245 : vector<8x32xi1>, vector<8x32xf32>
    %269 = vector.extract_strided_slice %171 {offsets = [4, 0], sizes = [1, 128], strides = [1, 1]} : vector<8x128xf32> to vector<1x128xf32>
    %cst_50 = arith.constant dense<0.000000e+00> : vector<1x128xf32>
    %270 = tpu.matmul %263, %172, %cst_50 {dimension_numbers = #tpu.dot_dimension_numbers<[1], [0], [0], [1], [0, 0, 1, 1], [], []>} : vector<1x32xf32>, vector<32x128xf32>, vector<1x128xf32> -> vector<1x128xf32>
    %271 = arith.addf %269, %270 : vector<1x128xf32>
    %272 = arith.negf %271 : vector<1x128xf32>
    %273 = math.exp %272 : vector<1x128xf32>
    %cst_51 = arith.constant 1.000000e+00 : f32
    %274 = vector.broadcast %cst_51 : f32 to vector<1x128xf32>
    %275 = arith.addf %274, %273 : vector<1x128xf32>
    %276 = arith.divf %274, %275 : vector<1x128xf32>
    %277 = math.tanh %271 : vector<1x128xf32>
    %278 = vector.extract_strided_slice %276 {offsets = [0, 0], sizes = [1, 32], strides = [1, 1]} : vector<1x128xf32> to vector<1x32xf32>
    %279 = vector.extract_strided_slice %276 {offsets = [0, 32], sizes = [1, 32], strides = [1, 1]} : vector<1x128xf32> to vector<1x32xf32>
    %280 = vector.extract_strided_slice %277 {offsets = [0, 64], sizes = [1, 32], strides = [1, 1]} : vector<1x128xf32> to vector<1x32xf32>
    %281 = vector.extract_strided_slice %276 {offsets = [0, 96], sizes = [1, 32], strides = [1, 1]} : vector<1x128xf32> to vector<1x32xf32>
    %282 = arith.mulf %279, %261 : vector<1x32xf32>
    %283 = arith.mulf %278, %280 : vector<1x32xf32>
    %284 = arith.addf %282, %283 : vector<1x32xf32>
    %285 = math.tanh %284 : vector<1x32xf32>
    %286 = arith.mulf %281, %285 : vector<1x32xf32>
    %c4_i32_52 = arith.constant 4 : i32
    %287 = vector.broadcast %c4_i32_52 : i32 to vector<8x32xi32>
    %288 = arith.cmpi eq, %175, %287 : vector<8x32xi32>
    %289 = vector.shape_cast %286 : vector<1x32xf32> to vector<1x32xf32>
    %290 = vector.broadcast %289 : vector<1x32xf32> to vector<8x32xf32>
    %291 = arith.select %288, %290, %268 : vector<8x32xi1>, vector<8x32xf32>
    %c0_53 = arith.constant 0 : index
    %c0_54 = arith.constant 0 : index
    %292 = vector.load %arg10[%c0_53, %c0_54] : memref<32x128xf32, #tpu.memory_space<vmem>>, vector<32x128xf32>
    %cst_55 = arith.constant dense<0.000000e+00> : vector<8x128xf32>
    %293 = tpu.matmul %291, %292, %cst_55 {dimension_numbers = #tpu.dot_dimension_numbers<[1], [0], [0], [1], [0, 0, 1, 1], [], []>} : vector<8x32xf32>, vector<32x128xf32>, vector<8x128xf32> -> vector<8x128xf32>
    %c0_56 = arith.constant 0 : index
    %c0_57 = arith.constant 0 : index
    %294 = vector.load %arg11[%c0_56, %c0_57] : memref<1x128xf32, #tpu.memory_space<vmem>>, vector<1x128xf32>
    %295 = vector.broadcast %294 : vector<1x128xf32> to vector<8x128xf32>
    %296 = arith.addf %293, %295 : vector<8x128xf32>
    %cst_58 = arith.constant dense<0xFF800000> : vector<8xf32>
    %297 = vector.multi_reduction <maximumf>, %296, %cst_58 [1] : vector<8x128xf32> to vector<8xf32>
    %298 = vector.shape_cast %297 : vector<8xf32> to vector<8x1xf32>
    %299 = vector.broadcast %298 : vector<8x1xf32> to vector<8x128xf32>
    %300 = arith.subf %296, %299 : vector<8x128xf32>
    %301 = math.exp %300 : vector<8x128xf32>
    %cst_59 = arith.constant dense<0.000000e+00> : vector<8xf32>
    %302 = vector.multi_reduction <add>, %301, %cst_59 [1] : vector<8x128xf32> to vector<8xf32>
    %303 = vector.shape_cast %302 : vector<8xf32> to vector<8x1xf32>
    %304 = math.log %303 : vector<8x1xf32>
    %305 = arith.addf %298, %304 : vector<8x1xf32>
    %306 = vector.broadcast %305 : vector<8x1xf32> to vector<8x128xf32>
    %307 = arith.subf %296, %306 : vector<8x128xf32>
    %c0_60 = arith.constant 0 : index
    %c0_61 = arith.constant 0 : index
    %308 = vector.load %arg12[%c0_60, %c0_61] : memref<8x128xf32, #tpu.memory_space<vmem>>, vector<8x128xf32>
    tpu.vector_store %arg12[%c0_60, %c0_61], %307 {strides = array<i32>} : memref<8x128xf32, #tpu.memory_space<vmem>>, vector<8x128xf32>,
    return
  }
}

</mosaic_0001>

<bundles_post_ra>
// kernel: tpu_custom_call.1
= control target key start
LH: loop header
LB: loop body
LE: loop exit
PB: predicated region body
PF: predicated region fallthrough
CT: control target
= control target key end

     0   :  { %17 = vsyncpa [#allocation3], 0  ;;  %s2655_s0 = inlined_call_operand.vmem [shape: s32[8,1], index: 0, kind: input, shape index: {}]   ;;  %s2656_s1 = inlined_call_operand.vmem [shape: f32[48,8], index: 1, kind: input, shape index: {}]   ;;  %s2657_s2 = inlined_call_operand.hbm [shape: f32[8,16], index: 2, kind: input, shape index: {}]   ;;  %s2658_s3 = inlined_call_operand.hbm [shape: f32[8,128], index: 3, kind: input, shape index: {}]   ;;  %s2659_s4 = inlined_call_operand.vmem [shape: f32[32,128], index: 4, kind: input, shape index: {}]   ;;  %s2660_s5 = inlined_call_operand.vmem [shape: f32[1,128], index: 5, kind: input, shape index: {}]   ;;  %s2661_s6 = inlined_call_operand.hbm [shape: f32[16,128], index: 6, kind: input, shape index: {}]   ;;  %s2662_s7 = inlined_call_operand.vmem [shape: f32[32,128], index: 7, kind: input, shape index: {}]   ;;  %s2663_s8 = inlined_call_operand.hbm [shape: f32[32,128], index: 8, kind: input, shape index: {}]   ;;  %s2664_s9 = inlined_call_operand.vmem [shape: f32[1,128], index: 9, kind: input, shape index: {}]   ;;  %s2665_s10 = inlined_call_operand.hbm [shape: f32[32,128], index: 10, kind: input, shape index: {}]   ;;  %s2666_s11 = inlined_call_operand.vmem [shape: f32[1,128], index: 11, kind: input, shape index: {}]   ;;  %s2667_s12 = inlined_call_operand.hbm [shape: f32[8,128], index: 12, kind: output, shape index: {}]  }
   0x1   :  { %18 = vsyncpa [#allocation6], 0 }
   0x2   :  { %19 = vsyncpa [#allocation9], 0 }
   0x3   :  { %20 = vsyncpa [#allocation4], 0  ;;  %s2225_s21 = smov [#allocation5]  }
   0x4   :  { %s41_s22 = sshll.u32 %s2225_s21, 4  ;;  %s42_s22 = int_to_ptr.vmem [resolvable:$true] %s41_s22 }
   0x5   :  { %s2105_s23 = scalar_lea.vmem %s42_s22, 128  ;;  %p2110_p1 = scmp.lt.s32.totalorder %s42_s22, %s42_s22 }
   0x6   :  { %p2106_p0 = scmp.ne.s32.totalorder %s42_s22, %s2105_s23  ;;  %p2111_p2 = scmp.lt.s32.totalorder %s2105_s23, %s2105_s23 }
   0x8   :  { %p2112_p3 = por %p2111_p2, %p2110_p1 }
   0xa   :  { %p2113_p4 = pnand %p2112_p3, %p2106_p0 }
   0xc   :  { %2116 = shalt.err (!%p2113_p4)
}
   0xd   :  { %44 = dma.hbm_to_vmem [thread:$0]  %s2658_s3, 128, %s42_s22, [#allocation6]  }
   0xe   :  { %s2226_s26 = smov [#allocation8]   ;;  %s2227_s28 = smov [#allocation2]  }
   0xf   :  { %s68_s27 = sshll.u32 %s2226_s26, 4  ;;  %s31_s29 = sshll.u32 %s2227_s28, 4  ;;  %s69_s27 = int_to_ptr.vmem [resolvable:$true] %s68_s27  ;;  %s32_s29 = int_to_ptr.vmem [resolvable:$true] %s31_s29 }
  0x10   :  { %s2125_s30 = scalar_lea.vmem %s69_s27, 512  ;;  %p2130_p6 = scmp.lt.s32.totalorder %s69_s27, %s69_s27 }
  0x11   :  { %p2126_p5 = scmp.ne.s32.totalorder %s69_s27, %s2125_s30  ;;  %p2131_p7 = scmp.lt.s32.totalorder %s2125_s30, %s2125_s30 }
  0x13   :  { %p2132_p8 = por %p2131_p7, %p2130_p6 }
  0x15   :  { %p2133_p9 = pnand %p2132_p8, %p2126_p5 }
  0x17   :  { %2136 = shalt.err (!%p2133_p9)
}
  0x18   :  { %s2228_s13 = smov 128   ;;  %s2229_s14 = smov 8  }
  0x19   :  { %74 = dma.hbm_to_vmem [thread:$0]  %s2663_s8, 512, %s69_s27, [#allocation9], %s2228_s13, %s2228_s13, %s2229_s14  }
  0x1a   :  { %s2145_s3 = scalar_lea.vmem %s32_s29, 128  ;;  %p2150_p11 = scmp.lt.s32.totalorder %s32_s29, %s32_s29 }
  0x1b   :  { %p2146_p10 = scmp.ne.s32.totalorder %s32_s29, %s2145_s3  ;;  %p2151_p12 = scmp.lt.s32.totalorder %s2145_s3, %s2145_s3 }
  0x1d   :  { %p2152_p13 = por %p2151_p12, %p2150_p11 }
  0x1f   :  { %p2153_p0 = pnand %p2152_p13, %p2146_p10 }
  0x21   :  { %2156 = shalt.err (!%p2153_p0)
}
  0x22   :  { %34 = dma.hbm_to_vmem [thread:$0]  %s2657_s2, 128, %s32_s29, [#allocation3]  }
  0x23   :  { %s2230_s19 = smov [#allocation7]   ;;  %s2231_s21 = smov [#allocation10]  }
  0x24   :  { %s54_s20 = sshll.u32 %s2230_s19, 4  ;;  %s82_s22 = sshll.u32 %s2231_s21, 4  ;;  %s55_s20 = int_to_ptr.vmem [resolvable:$true] %s54_s20  ;;  %s83_s22 = int_to_ptr.vmem [resolvable:$true] %s82_s22 }
  0x25   :  { %s2165_s23 = scalar_lea.vmem %s55_s20, 256  ;;  %p2170_p2 = scmp.lt.s32.totalorder %s55_s20, %s55_s20 }
  0x26   :  { %p2166_p1 = scmp.ne.s32.totalorder %s55_s20, %s2165_s23  ;;  %p2171_p3 = scmp.lt.s32.totalorder %s2165_s23, %s2165_s23 }
  0x28   :  { %p2172_p4 = por %p2171_p3, %p2170_p2 }
  0x2a   :  { %p2173_p5 = pnand %p2172_p4, %p2166_p1 }
  0x2c   :  { %2176 = shalt.err (!%p2173_p5)
}
  0x2d   :  { %60 = dma.hbm_to_vmem [thread:$0]  %s2661_s6, 256, %s55_s20, [#allocation6], %s2228_s13, %s2228_s13, %s2229_s14  }
  0x2e   :  { %s2185_s2 = scalar_lea.vmem %s83_s22, 512  ;;  %p2190_p7 = scmp.lt.s32.totalorder %s83_s22, %s83_s22 }
  0x2f   :  { %p2186_p6 = scmp.ne.s32.totalorder %s83_s22, %s2185_s2  ;;  %p2191_p8 = scmp.lt.s32.totalorder %s2185_s2, %s2185_s2 }
  0x31   :  { %p2192_p9 = por %p2191_p8, %p2190_p7 }
  0x33   :  { %p2193_p10 = pnand %p2192_p9, %p2186_p6 }
  0x35   :  { %2196 = shalt.err (!%p2193_p10)
}
  0x36   :  { %88 = dma.hbm_to_vmem [thread:$0]  %s2665_s10, 512, %s83_s22, [#allocation9], %s2228_s13, %s2228_s13, %s2229_s14  }
  0x37   :  { %2217 = dma.done.wait [#allocation3], 128  }
  0x38   :  { %2218 = vsyncadd [#allocation3], 4294967168 }
  0x39   :  { %2219 = dma.done.wait [#allocation6], 384  }
  0x3a   :  { %2220 = vsyncadd [#allocation6], 4294966912 }
  0x3b   :  { %2221 = dma.done.wait [#allocation9], 1024  }
  0x3c   :  { %2222 = vsyncadd [#allocation9], 4294966272  ;;  %v2232_v0 = vmov 0.0   ;;  %vm2233_vm0 = vmmov 0   ;;  %vm125_vm1 = vcmask 64512   ;;  %v117_v1 = vld [vmem:[#allocation5] sm:$0xff] }
  0x3d   :  { %1840 = vmatprep.subr.mxu1 %v2232_v0  ;;  %1848 = vmatprep.mubr.msk.f32.mxu1 %vm2233_vm0, %v2232_v0  ;;  %v2333_v2 = vld [vmem:[%s2659_s4 + $0x18] sm:$0xff]  ;;  %v111_v3 = vld [vmem:[%s2656_s1] sm:$0xff]  ;;  %v112_v4 = vld [vmem:[%s2656_s1 + $0x8] sm:$0xff]  ;;  %v2234_v9 = vmov 0   ;;  %vm239_vm4 = vcmask 261120   ;;  %vm967_vm14 = vcmask 130048  }
  0x3e   :  { %1829 = vmatprep.subr.mxu0 %v117_v1  ;;  %1841 = vmatpush3.msra.mxu1 %v2333_v2  ;;  %v2345_v5 = vld [vmem:[%s2659_s4 + $0x10] sm:$0xff]  ;;  %v2353_v6 = vld [vmem:[%s2659_s4 + $0x8] sm:$0xff]  ;;  %v2361_v7 = vld [vmem:[%s2659_s4] sm:$0xff]  ;;  %s2237_s16 = smov [#allocation11]  }
  0x3f   :  { %1830 = vmatpush3.msra.mxu0 %v117_v1  ;;  %1831 = vmatprep.mubr.msk.f32.mxu0 %vm125_vm1, %v111_v3  ;;  %v2389_v8 = vld [vmem:[%s2655_s0] sm:$0xff]  ;;  %s2235_s0 = smov 64   ;;  %v113_v28 = vld [vmem:[%s2656_s1 + $0x10] sm:$0xff]  ;;  %v114_v29 = vld [vmem:[%s2656_s1 + $0x18] sm:$0xff]  ;;  %s1711_s3 = sshll.u32 %s2237_s16, 4  ;;  %s1712_s3 = int_to_ptr.vmem [resolvable:$true] %s1711_s3 }
  0x40   :  { %1842 = vmatprep.subr.mxu1 %v2232_v0  ;;  %1832 = vmatmul.mubr.msk.f32.vlgmr.msra.gmra.mxu0 %vm125_vm1, %v112_v4  ;;  %vm338_vm2 = vcmp.gt.s32.totalorder %v2389_v8, 0  ;;  %v2398_v12 = vld [vmem:[%s2660_s5] ss:$0 sm:$0xff]  ;;  %s2236_s5 = smov 32   ;;  %v116_v31 = vld [vmem:[%s2656_s1 + $0x28] sm:$0xff]  ;;  %vm446_vm5 = vcmp.gt.s32.totalorder %v2389_v8, 1  ;;  %p2202_p12 = scmp.lt.s32.totalorder %s1712_s3, %s1712_s3 }
  0x41   :  { %1843 = vmatpush3.msra.mxu1 %v2345_v5  ;;  %1851 = vmatprep.subr.mxu0 %v2232_v0  ;;  %v339_v10 = vsel %vm338_vm2, 1, %v2234_v9  ;;  %v115_v30 = vld [vmem:[%s2656_s1 + $0x20] sm:$0xff]  ;;  %v447_v47 = vsel %vm446_vm5, 1, %v2234_v9  ;;  %vm554_vm7 = vcmp.gt.s32.totalorder %v2389_v8, 2  ;;  %vm662_vm9 = vcmp.gt.s32.totalorder %v2389_v8, 3 }
  0x42   :  { %1844 = vmatprep.subr.mxu1 %v2232_v0  ;;  %1852 = vmatpush3.msra.mxu0 %v2333_v2  ;;  %vm770_vm11 = vcmp.gt.s32.totalorder %v2389_v8, 4  ;;  %vm878_vm13 = vcmp.gt.s32.totalorder %v2389_v8, 5 }
  0x43   :  { %1845 = vmatpush3.msra.mxu1 %v2353_v6  ;;  %1853 = vmatprep.subr.mxu0 %v2232_v0 }
  0x44   :  { %1846 = vmatprep.subr.mxu1 %v2232_v0  ;;  %1854 = vmatpush3.msra.mxu0 %v2345_v5 }
  0x45   :  { %1847 = vmatpush3.msra.mxu1 %v2361_v7  ;;  %1855 = vmatprep.subr.mxu0 %v2232_v0 }
  0x46   :  { %1849 = vmatmul.mubr.f32.vlgmr.msra.gmra.mxu1 %v2232_v0  ;;  %1856 = vmatpush3.msra.mxu0 %v2353_v6 }
  0x47   :  { %1857 = vmatprep.subr.mxu0 %v2232_v0  ;;  %1862 = vmatprep.subr.mxu1 %v2232_v0 }
  0x48   :  { %1858 = vmatpush3.msra.mxu0 %v2361_v7  ;;  %1863 = vmatpush3.msra.mxu1 %v2333_v2 }
  0x49   :  { %1864 = vmatprep.subr.mxu1 %v2232_v0  ;;  %1870 = vmatprep.mubr.msk.f32.mxu1 %vm2233_vm0, %v2232_v0 }
  0x4a   :  { %1865 = vmatpush3.msra.mxu1 %v2345_v5  ;;  %1873 = vmatprep.subr.mxu0 %v2232_v0 }
  0x4b   :  { %1866 = vmatprep.subr.mxu1 %v2232_v0  ;;  %2003 = vset.pattern.permute.xlu1 %v2234_v9 }
  0x4c   :  { %1867 = vmatpush3.msra.mxu1 %v2353_v6  ;;  %2004 = vset.pattern.permute.xlu0 %v2234_v9 }
  0x4d   :  { %1868 = vmatprep.subr.mxu1 %v2232_v0  ;;  %341 = vperm.xlu1 %2003, %v339_v10  }
  0x4e   :  { %1869 = vmatpush3.msra.mxu1 %v2361_v7  ;;  %1834 = vmatprep.mubr.msk.f32.mxu0 %vm125_vm1, %v113_v28 }
  0x4f   :  { %1884 = vmatprep.subr.mxu1 %v2232_v0  ;;  %1835 = vmatmul.mubr.msk.f32.gmra.mxu0 %vm125_vm1, %v114_v29 }
  0x50   :  { %1837 = vmatprep.mubr.msk.f32.mxu0 %vm125_vm1, %v115_v30 }
  0x53   :  { %1838 = vmatmul.mubr.msk.f32.gmra.mxu0 %vm125_vm1, %v116_v31 }
  0x54   :  { %1859 = vmatprep.mubr.msk.f32.mxu0 %vm2233_vm0, %v2232_v0 }
  0xc8   :  { %v342_v33 = vpop.permute.xlu1 %341 }
  0xc9   :  { %vm343_vm3 = vcmp.eq.s32.totalorder %v342_v33, 1 }
 0x100   :  { %v1833_v11 = vpop.f32.mrf.mxu0 }
 0x101   :  { %v216_v42 = vadd.f32 %v1833_v11, %v2398_v12 }
 0x102   :  { %v210_v13 = vpop.f32.mrf.mxu0 }
 0x103   :  { %v211_v14 = vadd.f32 %v2398_v12, %v210_v13  ;;  %v555_v13 = vsel %vm554_vm7, 1, %v2234_v9 }
 0x106   :  { %v309_v15 = vpop.f32.mrf.mxu1 }
 0x107   :  { %v313_v16 = vadd.f32 %v309_v15, %v211_v14 }
 0x108   :  { %v1850_v17 = vpop.f32.mrf.mxu1 }
 0x109   :  { %2005 = vtanh.f32 %v313_v16  ;;  %v1729_v19 = vmul.f32 -1.442695, %v313_v16 }
 0x10b   :  { %2007 = vpow2.f32 %v1729_v19 }
 0x10f   :  { %v2435_v38 = vpop.f32.mrf.mxu0 }
 0x111   :  { %v220_v39 = vpop.f32.mrf.mxu0 }
 0x112   :  { %v221_v1 = vadd.f32 %v2398_v12, %v220_v39 }
 0x113   :  { %v2437_v40 = vpop.f32.mrf.mxu0 }
 0x115   :  { %v2439_v41 = vpop.f32.mrf.mxu0 }
 0x116   :  { %v2006_v18 = vpop.eup %2005 }
 0x117   :  { %323 = vrot.lane.b32.xlu0 %v2006_v18, %s2235_s0 }
 0x118   :  { %v2008_v20 = vpop.eup %2007 }
 0x119   :  { %v317_v21 = vadd.f32 1.0, %v2008_v20 }
 0x11b   :  { %2009 = vrcp.f32 %v317_v21 }
 0x128   :  { %v2010_v22 = vpop.eup %2009 }
 0x129   :  { %v321_v25 = vmul.f32 0.0, %v2010_v22 }
 0x189   :  { %v324_v23 = vpop.permute.xlu0 %323 }
 0x18a   :  { %v326_v24 = vmul.f32 %v2010_v22, %v324_v23 }
 0x18c   :  { %328 = vrot.lane.b32.xlu0 %v326_v24, %s2236_s5 }
 0x1fe   :  { %v329_v26 = vpop.permute.xlu0 %328 }
 0x1ff   :  { %v331_v27 = vadd.f32 %v329_v26, %v321_v25 }
 0x201   :  { %2011 = vtanh.f32 %v331_v27  ;;  %v345_v54 = vsel %vm343_vm3, %v331_v27, 0.0 }
 0x20e   :  { %v2012_v32 = vpop.eup %2011 }
 0x20f   :  { %334 = vrot.lane.b32.xlu1 %v2012_v32, %s2235_s0 }
 0x281   :  { %v335_v34 = vpop.permute.xlu1 %334 }
 0x282   :  { %v337_v35 = vmul.f32 %v2010_v22, %v335_v34 }
 0x284   :  { %v344_v36 = vsel %vm343_vm3, %v337_v35, 0.0 }
 0x285   :  { %347 = vrot.lane.b32.xlu0 %v344_v36, %s2236_s5 }
 0x2f7   :  { %v348_v37 = vpop.permute.xlu0 %347 }
 0x2f8   :  { %1860 = vmatmul.mubr.msk.f32.vlgmr.msra.gmra.mxu0 %vm239_vm4, %v348_v37 }
 0x2f9   :  { %1874 = vmatpush3.msra.mxu0 %v2333_v2  ;;  %1881 = vmatprep.mubr.msk.f32.mxu0 %vm2233_vm0, %v2232_v0 }
 0x2fa   :  { %1875 = vmatprep.subr.mxu0 %v2232_v0 }
 0x2fb   :  { %1876 = vmatpush3.msra.mxu0 %v2345_v5 }
 0x2fc   :  { %1877 = vmatprep.subr.mxu0 %v2232_v0 }
 0x2fd   :  { %1878 = vmatpush3.msra.mxu0 %v2353_v6 }
 0x2fe   :  { %1879 = vmatprep.subr.mxu0 %v2232_v0 }
 0x2ff   :  { %1880 = vmatpush3.msra.mxu0 %v2361_v7 }
 0x300   :  { %1895 = vmatprep.subr.mxu0 %v2232_v0 }
 0x3b8   :  { %v417_v43 = vpop.f32.mrf.mxu0 }
 0x3b9   :  { %v421_v44 = vadd.f32 %v417_v43, %v216_v42 }
 0x3ba   :  { %v1861_v45 = vpop.f32.mrf.mxu0 }
 0x3bb   :  { %2013 = vtanh.f32 %v421_v44  ;;  %v1731_v48 = vmul.f32 -1.442695, %v421_v44 }
 0x3bd   :  { %2015 = vpow2.f32 %v1731_v48 }
 0x3c8   :  { %v2014_v46 = vpop.eup %2013 }
 0x3c9   :  { %431 = vrot.lane.b32.xlu1 %v2014_v46, %s2235_s0 }
 0x3ca   :  { %v2016_v49 = vpop.eup %2015 }
 0x3cb   :  { %v425_v50 = vadd.f32 1.0, %v2016_v49 }
 0x3cd   :  { %449 = vperm.xlu1 %2003, %v447_v47   ;;  %2017 = vrcp.f32 %v425_v50  ;;  %v231_v50 = vadd.f32 %v2398_v12, %v2439_v41 }
 0x3da   :  { %v2018_v51 = vpop.eup %2017 }
 0x3db   :  { %v429_v55 = vmul.f32 %v2018_v51, %v345_v54 }
 0x43b   :  { %v432_v52 = vpop.permute.xlu1 %431 }
 0x43c   :  { %v434_v53 = vmul.f32 %v2018_v51, %v432_v52 }
 0x43e   :  { %436 = vrot.lane.b32.xlu0 %v434_v53, %s2236_s5 }
 0x448   :  { %v450_v59 = vpop.permute.xlu1 %449 }
 0x449   :  { %vm451_vm6 = vcmp.eq.s32.totalorder %v450_v59, 1 }
 0x4b0   :  { %v437_v56 = vpop.permute.xlu0 %436 }
 0x4b1   :  { %v439_v57 = vadd.f32 %v437_v56, %v429_v55  ;;  %v771_v55 = vsel %vm770_vm11, 1, %v2234_v9 }
 0x4b3   :  { %2019 = vtanh.f32 %v439_v57  ;;  %v453_v20 = vsel %vm451_vm6, %v439_v57, %v345_v54 }
 0x4c0   :  { %v2020_v58 = vpop.eup %2019 }
 0x4c1   :  { %442 = vrot.lane.b32.xlu0 %v2020_v58, %s2235_s0 }
 0x533   :  { %v443_v60 = vpop.permute.xlu0 %442 }
 0x534   :  { %v445_v61 = vmul.f32 %v2018_v51, %v443_v60 }
 0x536   :  { %v452_v62 = vsel %vm451_vm6, %v445_v61, %v344_v36 }
 0x537   :  { %455 = vrot.lane.b32.xlu1 %v452_v62, %s2236_s5 }
 0x5a9   :  { %v456_v63 = vpop.permute.xlu1 %455 }
 0x5aa   :  { %1871 = vmatmul.mubr.msk.f32.vlgmr.msra.gmra.mxu1 %vm239_vm4, %v456_v63 }
 0x5ab   :  { %1885 = vmatpush3.msra.mxu1 %v2333_v2  ;;  %1892 = vmatprep.mubr.msk.f32.mxu1 %vm2233_vm0, %v2232_v0 }
 0x5ac   :  { %1886 = vmatprep.subr.mxu1 %v2232_v0 }
 0x5ad   :  { %1887 = vmatpush3.msra.mxu1 %v2345_v5 }
 0x5ae   :  { %1888 = vmatprep.subr.mxu1 %v2232_v0 }
 0x5af   :  { %1889 = vmatpush3.msra.mxu1 %v2353_v6 }
 0x5b0   :  { %1890 = vmatprep.subr.mxu1 %v2232_v0 }
 0x5b1   :  { %1891 = vmatpush3.msra.mxu1 %v2361_v7 }
 0x5b2   :  { %1906 = vmatprep.subr.mxu1 %v2232_v0 }
 0x66a   :  { %v525_v3 = vpop.f32.mrf.mxu1 }
 0x66b   :  { %v529_v4 = vadd.f32 %v525_v3, %v221_v1 }
 0x66c   :  { %v1872_v10 = vpop.f32.mrf.mxu1 }
 0x66d   :  { %2021 = vtanh.f32 %v529_v4  ;;  %v1733_v14 = vmul.f32 -1.442695, %v529_v4 }
 0x66f   :  { %2023 = vpow2.f32 %v1733_v14 }
 0x67a   :  { %v2022_v11 = vpop.eup %2021 }
 0x67b   :  { %539 = vrot.lane.b32.xlu0 %v2022_v11, %s2235_s0 }
 0x67c   :  { %v2024_v15 = vpop.eup %2023 }
 0x67d   :  { %v533_v16 = vadd.f32 1.0, %v2024_v15  ;;  %v236_v15 = vadd.f32 %v2437_v40, %v2398_v12 }
 0x67f   :  { %557 = vperm.xlu0 %2004, %v555_v13   ;;  %2025 = vrcp.f32 %v533_v16 }
 0x68c   :  { %v2026_v17 = vpop.eup %2025 }
 0x68d   :  { %v537_v21 = vmul.f32 %v2026_v17, %v453_v20 }
 0x6ed   :  { %v540_v18 = vpop.permute.xlu0 %539 }
 0x6ee   :  { %v542_v19 = vmul.f32 %v2026_v17, %v540_v18 }
 0x6f0   :  { %544 = vrot.lane.b32.xlu1 %v542_v19, %s2236_s5 }
 0x6fa   :  { %v558_v25 = vpop.permute.xlu0 %557 }
 0x6fb   :  { %vm559_vm8 = vcmp.eq.s32.totalorder %v558_v25, 1 }
 0x762   :  { %v545_v22 = vpop.permute.xlu1 %544 }
 0x763   :  { %v547_v23 = vadd.f32 %v545_v22, %v537_v21 }
 0x765   :  { %2027 = vtanh.f32 %v547_v23 }
 0x772   :  { %v2028_v24 = vpop.eup %2027 }
 0x773   :  { %550 = vrot.lane.b32.xlu1 %v2028_v24, %s2235_s0 }
 0x7e5   :  { %v551_v26 = vpop.permute.xlu1 %550 }
 0x7e6   :  { %v553_v27 = vmul.f32 %v2026_v17, %v551_v26 }
 0x7e8   :  { %v560_v28 = vsel %vm559_vm8, %v553_v27, %v452_v62 }
 0x7e9   :  { %563 = vrot.lane.b32.xlu1 %v560_v28, %s2236_s5 }
 0x85b   :  { %v564_v29 = vpop.permute.xlu1 %563 }
 0x85c   :  { %1882 = vmatmul.mubr.msk.f32.vlgmr.msra.gmra.mxu0 %vm239_vm4, %v564_v29  ;;  %v887_v29 = vld [vmem:[#allocation7 + $0x8] sm:$0xff] }
 0x85d   :  { %1896 = vmatpush3.msra.mxu0 %v2333_v2  ;;  %1903 = vmatprep.mubr.msk.f32.mxu0 %vm2233_vm0, %v2232_v0  ;;  %v226_v2 = vadd.f32 %v2435_v38, %v2398_v12  ;;  %v561_v38 = vsel %vm559_vm8, %v547_v23, %v453_v20  ;;  %v879_v20 = vsel %vm878_vm13, 1, %v2234_v9 }
 0x85e   :  { %1897 = vmatprep.subr.mxu0 %v2232_v0 }
 0x85f   :  { %1898 = vmatpush3.msra.mxu0 %v2345_v5 }
 0x860   :  { %1899 = vmatprep.subr.mxu0 %v2232_v0 }
 0x861   :  { %1900 = vmatpush3.msra.mxu0 %v2353_v6  ;;  %v663_v6 = vsel %vm662_vm9, 1, %v2234_v9  ;;  %v891_v9 = vld [vmem:[%s2662_s7 + $0x18] sm:$0xff] }
 0x862   :  { %1901 = vmatprep.subr.mxu0 %v2232_v0 }
 0x863   :  { %1902 = vmatpush3.msra.mxu0 %v2361_v7 }
 0x864   :  { %1917 = vmatprep.subr.mxu0 %v2232_v0 }
 0x91c   :  { %v633_v30 = vpop.f32.mrf.mxu0 }
 0x91d   :  { %v637_v31 = vadd.f32 %v633_v30, %v226_v2  ;;  %v886_v2 = vld [vmem:[#allocation7] sm:$0xff]  ;;  %v889_v30 = vld [vmem:[%s2662_s7 + $0x8] sm:$0xff] }
 0x91e   :  { %v1883_v32 = vpop.f32.mrf.mxu0 }
 0x91f   :  { %2029 = vtanh.f32 %v637_v31  ;;  %v1735_v33 = vmul.f32 -1.442695, %v637_v31  ;;  %v888_v31 = vld [vmem:[%s2662_s7] sm:$0xff] }
 0x921   :  { %2031 = vpow2.f32 %v1735_v33  ;;  %v2541_v33 = vld [vmem:[#allocation8 + $0x10] sm:$0xff] }
 0x92c   :  { %v2030_v5 = vpop.eup %2029 }
 0x92d   :  { %647 = vrot.lane.b32.xlu0 %v2030_v5, %s2235_s0  ;;  %v885_v5 = vld [vmem:[#allocation2] sm:$0xff] }
 0x92e   :  { %v2032_v7 = vpop.eup %2031 }
 0x92f   :  { %v641_v34 = vadd.f32 1.0, %v2032_v7  ;;  %v2545_v7 = vld [vmem:[#allocation8 + $0x8] sm:$0xff] }
 0x931   :  { %665 = vperm.xlu0 %2004, %v663_v6   ;;  %2033 = vrcp.f32 %v641_v34  ;;  %v2536_v6 = vld [vmem:[#allocation8 + $0x18] sm:$0xff]  ;;  %v2549_v34 = vld [vmem:[#allocation8] sm:$0xff] }
 0x93e   :  { %v2034_v35 = vpop.eup %2033 }
 0x93f   :  { %v645_v39 = vmul.f32 %v2034_v35, %v561_v38 }
 0x99f   :  { %v648_v36 = vpop.permute.xlu0 %647 }
 0x9a0   :  { %v650_v37 = vmul.f32 %v2034_v35, %v648_v36 }
 0x9a2   :  { %652 = vrot.lane.b32.xlu1 %v650_v37, %s2236_s5 }
 0x9ac   :  { %v666_v45 = vpop.permute.xlu0 %665 }
 0x9ad   :  { %vm667_vm10 = vcmp.eq.s32.totalorder %v666_v45, 1 }
 0xa14   :  { %v653_v42 = vpop.permute.xlu1 %652 }
 0xa15   :  { %v655_v43 = vadd.f32 %v653_v42, %v645_v39 }
 0xa17   :  { %2035 = vtanh.f32 %v655_v43  ;;  %v669_v61 = vsel %vm667_vm10, %v655_v43, %v561_v38 }
 0xa24   :  { %v2036_v44 = vpop.eup %2035 }
 0xa25   :  { %658 = vrot.lane.b32.xlu1 %v2036_v44, %s2235_s0 }
 0xa97   :  { %v659_v46 = vpop.permute.xlu1 %658 }
 0xa98   :  { %v661_v47 = vmul.f32 %v2034_v35, %v659_v46 }
 0xa9a   :  { %v668_v48 = vsel %vm667_vm10, %v661_v47, %v560_v28  ;;  %v890_v28 = vld [vmem:[%s2662_s7 + $0x10] sm:$0xff]  ;;  %v1742_v47 = vld [vmem:[%s2664_s9] ss:$0 sm:$0xff] }
 0xa9b   :  { %671 = vrot.lane.b32.xlu0 %v668_v48, %s2236_s5 }
 0xb0d   :  { %v672_v49 = vpop.permute.xlu0 %671 }
 0xb0e   :  { %1893 = vmatmul.mubr.msk.f32.vlgmr.msra.gmra.mxu1 %vm239_vm4, %v672_v49 }
 0xb0f   :  { %1914 = vmatprep.mubr.msk.f32.mxu1 %vm2233_vm0, %v2232_v0  ;;  %1907 = vmatpush3.msra.mxu1 %v891_v9 }
 0xb10   :  { %1908 = vmatprep.subr.mxu1 %v2232_v0 }
 0xb11   :  { %1909 = vmatpush3.msra.mxu1 %v890_v28 }
 0xb12   :  { %1910 = vmatprep.subr.mxu1 %v2232_v0 }
 0xb13   :  { %1911 = vmatpush3.msra.mxu1 %v889_v30 }
 0xb14   :  { %1912 = vmatprep.subr.mxu1 %v2232_v0 }
 0xb15   :  { %1913 = vmatpush3.msra.mxu1 %v888_v31 }
 0xb16   :  { %1924 = vmatprep.subr.mxu1 %v2232_v0 }
 0xbce   :  { %v741_v51 = vpop.f32.mrf.mxu1 }
 0xbcf   :  { %v745_v52 = vadd.f32 %v741_v51, %v231_v50 }
 0xbd0   :  { %v1894_v53 = vpop.f32.mrf.mxu1 }
 0xbd1   :  { %2037 = vtanh.f32 %v745_v52  ;;  %v1737_v56 = vmul.f32 -1.442695, %v745_v52 }
 0xbd3   :  { %2039 = vpow2.f32 %v1737_v56 }
 0xbde   :  { %v2038_v54 = vpop.eup %2037 }
 0xbdf   :  { %755 = vrot.lane.b32.xlu1 %v2038_v54, %s2235_s0 }
 0xbe0   :  { %v2040_v57 = vpop.eup %2039 }
 0xbe1   :  { %v749_v58 = vadd.f32 1.0, %v2040_v57 }
 0xbe3   :  { %773 = vperm.xlu1 %2003, %v771_v55   ;;  %2041 = vrcp.f32 %v749_v58 }
 0xbf0   :  { %v2042_v59 = vpop.eup %2041 }
 0xbf1   :  { %v753_v62 = vmul.f32 %v2042_v59, %v669_v61 }
 0xc51   :  { %v756_v60 = vpop.permute.xlu1 %755 }
 0xc52   :  { %v758_v41 = vmul.f32 %v2042_v59, %v756_v60 }
 0xc54   :  { %760 = vrot.lane.b32.xlu0 %v758_v41, %s2236_s5 }
 0xc5e   :  { %v774_v4 = vpop.permute.xlu1 %773 }
 0xc5f   :  { %vm775_vm12 = vcmp.eq.s32.totalorder %v774_v4, 1 }
 0xcc6   :  { %v761_v63 = vpop.permute.xlu0 %760 }
 0xcc7   :  { %v763_v1 = vadd.f32 %v761_v63, %v753_v62 }
 0xcc9   :  { %2043 = vtanh.f32 %v763_v1  ;;  %v777_v40 = vsel %vm775_vm12, %v763_v1, %v669_v61 }
 0xcd6   :  { %v2044_v3 = vpop.eup %2043 }
 0xcd7   :  { %766 = vrot.lane.b32.xlu0 %v2044_v3, %s2235_s0 }
 0xd49   :  { %v767_v10 = vpop.permute.xlu0 %766 }
 0xd4a   :  { %v769_v11 = vmul.f32 %v2042_v59, %v767_v10 }
 0xd4c   :  { %v2503_v13 = vsel %vm775_vm12, %v769_v11, %v668_v48 }
 0xd4d   :  { %779 = vrot.lane.b32.xlu1 %v2503_v13, %s2236_s5 }
 0xdbf   :  { %v780_v14 = vpop.permute.xlu1 %779 }
 0xdc0   :  { %1904 = vmatmul.mubr.msk.f32.vlgmr.msra.gmra.mxu0 %vm239_vm4, %v780_v14 }
 0xdc1   :  { %1921 = vmatprep.mubr.msk.f32.mxu0 %vm2233_vm0, %v2232_v0  ;;  %1918 = vmatpush3.msra.mxu0 %v887_v29 }
 0xdc2   :  { %1919 = vmatprep.subr.mxu0 %v2232_v0 }
 0xdc3   :  { %1920 = vmatpush3.msra.mxu0 %v886_v2 }
 0xdc4   :  { %1935 = vmatprep.subr.mxu0 %v2232_v0  ;;  %1922 = vmatmul.mubr.msk.f32.vlgmr.msra.gmra.mxu0 %vm967_vm14, %v885_v5 }
 0xdc5   :  { %1936 = vmatpush3.msra.mxu0 %v2536_v6  ;;  %1943 = vmatprep.mubr.msk.f32.mxu0 %vm2233_vm0, %v2232_v0 }
 0xdc6   :  { %1937 = vmatprep.subr.mxu0 %v2232_v0 }
 0xdc7   :  { %1938 = vmatpush3.msra.mxu0 %v2541_v33 }
 0xdc8   :  { %1939 = vmatprep.subr.mxu0 %v2232_v0 }
 0xdc9   :  { %1940 = vmatpush3.msra.mxu0 %v2545_v7 }
 0xdca   :  { %1941 = vmatprep.subr.mxu0 %v2232_v0 }
 0xdcb   :  { %1942 = vmatpush3.msra.mxu0 %v2549_v34 }
 0xdcc   :  { %1957 = vmatprep.subr.mxu0 %v2232_v0 }
 0xe80   :  { %v849_v16 = vpop.f32.mrf.mxu0 }
 0xe81   :  { %v853_v17 = vadd.f32 %v849_v16, %v236_v15 }
 0xe82   :  { %v1905_v18 = vpop.f32.mrf.mxu0 }
 0xe83   :  { %2045 = vtanh.f32 %v853_v17  ;;  %v1739_v21 = vmul.f32 -1.442695, %v853_v17 }
 0xe84   :  { %v1037_v42 = vpop.f32.mrf.mxu0 }
 0xe85   :  { %2047 = vpow2.f32 %v1739_v21 }
 0xe86   :  { %v1923_v43 = vpop.f32.mrf.mxu0 }
 0xe90   :  { %v2046_v19 = vpop.eup %2045 }
 0xe91   :  { %863 = vrot.lane.b32.xlu0 %v2046_v19, %s2235_s0 }
 0xe92   :  { %v2048_v22 = vpop.eup %2047 }
 0xe93   :  { %v857_v23 = vadd.f32 1.0, %v2048_v22 }
 0xe95   :  { %881 = vperm.xlu0 %2004, %v879_v20   ;;  %2049 = vrcp.f32 %v857_v23 }
 0xea2   :  { %v2050_v24 = vpop.eup %2049 }
 0xea3   :  { %v861_v26 = vmul.f32 %v2050_v24, %v777_v40 }
 0xf03   :  { %v864_v25 = vpop.permute.xlu0 %863 }
 0xf04   :  { %v866_v12 = vmul.f32 %v2050_v24, %v864_v25  ;;  %v1053_v25 = vlaneseq }
 0xf06   :  { %868 = vrot.lane.b32.xlu1 %v866_v12, %s2236_s5  ;;  %v2603_v12 = vshrl.u32 %v1053_v25, 7 }
 0xf08   :  { %v1153_v40 = vsub.s32 0, %v2603_v12  ;;  %vm1150_vm1 = vcmp.eq.s32.totalorder %v2603_v12, 0  ;;  %vm1262_vm2 = vcmp.eq.s32.totalorder %v2603_v12, 1  ;;  %vm1375_vm3 = vcmp.eq.s32.totalorder %v2603_v12, 2 }
 0xf09   :  { %vm1601_vm5 = vcmp.eq.s32.totalorder %v2603_v12, 4 }
 0xf10   :  { %v882_v35 = vpop.permute.xlu0 %881 }
 0xf11   :  { %vm883_vm15 = vcmp.eq.s32.totalorder %v882_v35, 1 }
 0xf78   :  { %v869_v8 = vpop.permute.xlu1 %868 }
 0xf79   :  { %v871_v27 = vadd.f32 %v869_v8, %v861_v26  ;;  %v1265_v26 = vsub.s32 1, %v2603_v12 }
 0xf7b   :  { %2051 = vtanh.f32 %v871_v27 }
 0xf88   :  { %v2052_v32 = vpop.eup %2051 }
 0xf89   :  { %874 = vrot.lane.b32.xlu1 %v2052_v32, %s2235_s0 }
 0xffb   :  { %v875_v36 = vpop.permute.xlu1 %874 }
 0xffc   :  { %v877_v37 = vmul.f32 %v2050_v24, %v875_v36 }
 0xffe   :  { %v884_v38 = vsel %vm883_vm15, %v877_v37, %v2503_v13 }
 0xfff   :  { %893 = vrot.lane.b32.xlu0 %v884_v38, %s2236_s5 }
0x1071   :  { %v894_v39 = vpop.permute.xlu0 %893 }
0x1072   :  { %1915 = vmatmul.mubr.msk.f32.vlgmr.msra.gmra.mxu1 %vm239_vm4, %v894_v39 }
0x1073   :  { %1925 = vmatpush3.msra.mxu1 %v2536_v6  ;;  %1932 = vmatprep.mubr.msk.f32.mxu1 %vm2233_vm0, %v2232_v0 }
0x1074   :  { %1926 = vmatprep.subr.mxu1 %v2232_v0 }
0x1075   :  { %1927 = vmatpush3.msra.mxu1 %v2541_v33 }
0x1076   :  { %1928 = vmatprep.subr.mxu1 %v2232_v0 }
0x1077   :  { %1929 = vmatpush3.msra.mxu1 %v2545_v7 }
0x1078   :  { %1930 = vmatprep.subr.mxu1 %v2232_v0 }
0x1079   :  { %1931 = vmatpush3.msra.mxu1 %v2549_v34 }
0x107a   :  { %1933 = vmatmul.mubr.f32.vlgmr.msra.gmra.mxu1 %v2232_v0  ;;  %1946 = vmatprep.subr.mxu1 %v2232_v0 }
0x107b   :  { %1947 = vmatpush3.msra.mxu1 %v2536_v6  ;;  %1954 = vmatprep.mubr.msk.f32.mxu1 %vm2233_vm0, %v2232_v0 }
0x107c   :  { %1948 = vmatprep.subr.mxu1 %v2232_v0 }
0x107d   :  { %1949 = vmatpush3.msra.mxu1 %v2541_v33 }
0x107e   :  { %1950 = vmatprep.subr.mxu1 %v2232_v0 }
0x107f   :  { %1951 = vmatpush3.msra.mxu1 %v2545_v7 }
0x1080   :  { %1952 = vmatprep.subr.mxu1 %v2232_v0 }
0x1081   :  { %1953 = vmatpush3.msra.mxu1 %v2549_v34 }
0x1082   :  { %1968 = vmatprep.subr.mxu1 %v2232_v0 }
0x1132   :  { %v963_v44 = vpop.f32.mrf.mxu1 }
0x1133   :  { %v1038_v46 = vadd.f32 %v1037_v42, %v963_v44 }
0x1134   :  { %v1916_v45 = vpop.f32.mrf.mxu1 }
0x1135   :  { %v2581_v48 = vadd.f32 %v1742_v47, %v1038_v46  ;;  %v1378_v47 = vsub.s32 2, %v2603_v12 }
0x113a   :  { %v1121_v49 = vpop.f32.mrf.mxu1 }
0x113b   :  { %v1125_v50 = vadd.f32 %v1121_v49, %v2581_v48 }
0x113c   :  { %v1934_v51 = vpop.f32.mrf.mxu1 }
0x113d   :  { %2053 = vtanh.f32 %v1125_v50  ;;  %v1743_v53 = vmul.f32 -1.442695, %v1125_v50 }
0x113f   :  { %2055 = vpow2.f32 %v1743_v53 }
0x114a   :  { %v2054_v52 = vpop.eup %2053 }
0x114b   :  { %1135 = vrot.lane.b32.xlu1 %v2054_v52, %s2235_s0 }
0x114c   :  { %v2056_v54 = vpop.eup %2055 }
0x114d   :  { %v1129_v55 = vadd.f32 1.0, %v2056_v54 }
0x114f   :  { %2057 = vrcp.f32 %v1129_v55 }
0x115c   :  { %v2058_v56 = vpop.eup %2057 }
0x115d   :  { %v1133_v59 = vmul.f32 0.0, %v2058_v56 }
0x11bd   :  { %v1136_v57 = vpop.permute.xlu1 %1135 }
0x11be   :  { %v1138_v58 = vmul.f32 %v2058_v56, %v1136_v57 }
0x11c0   :  { %1140 = vrot.lane.b32.xlu0 %v1138_v58, %s2236_s5 }
0x1232   :  { %v1141_v60 = vpop.permute.xlu0 %1140 }
0x1233   :  { %v1143_v41 = vadd.f32 %v1141_v60, %v1133_v59 }
0x1235   :  { %2059 = vtanh.f32 %v1143_v41  ;;  %v1243_v20 = vrot.slane %v1143_v41, 7 }
0x1242   :  { %v2060_v61 = vpop.eup %2059 }
0x1243   :  { %1146 = vrot.lane.b32.xlu1 %v2060_v61, %s2235_s0 }
0x12b5   :  { %v1147_v62 = vpop.permute.xlu1 %1146 }
0x12b6   :  { %v1149_v63 = vmul.f32 %v2058_v56, %v1147_v62 }
0x12b8   :  { %1157 = vrot.lane.b32.xlu0 %v1149_v63, %s2236_s5  ;;  %v1154_v8 = vrot.slane %v1149_v63, %v1153_v40 }
0x12ba   :  { %v1155_v2 = vsel %vm1150_vm1, %v1154_v8, 0.0 }
0x132a   :  { %v1158_v1 = vpop.permute.xlu0 %1157 }
0x132b   :  { %1944 = vmatmul.mubr.msk.f32.vlgmr.msra.gmra.mxu0 %vm239_vm4, %v1158_v1 }
0x132c   :  { %1958 = vmatpush3.msra.mxu0 %v2536_v6  ;;  %1965 = vmatprep.mubr.msk.f32.mxu0 %vm2233_vm0, %v2232_v0 }
0x132d   :  { %1959 = vmatprep.subr.mxu0 %v2232_v0 }
0x132e   :  { %1960 = vmatpush3.msra.mxu0 %v2541_v33 }
0x132f   :  { %1961 = vmatprep.subr.mxu0 %v2232_v0 }
0x1330   :  { %1962 = vmatpush3.msra.mxu0 %v2545_v7 }
0x1331   :  { %1963 = vmatprep.subr.mxu0 %v2232_v0 }
0x1332   :  { %1964 = vmatpush3.msra.mxu0 %v2549_v34 }
0x1333   :  { %1979 = vmatprep.subr.mxu0 %v2232_v0 }
0x13eb   :  { %v1227_v3 = vpop.f32.mrf.mxu0 }
0x13ec   :  { %v1232_v4 = vrot.slane %v1227_v3, 7 }
0x13ed   :  { %v1945_v10 = vpop.f32.mrf.mxu0 }
0x13ee   :  { %v1234_v11 = vadd.f32 %v1232_v4, %v2581_v48 }
0x13f0   :  { %2061 = vtanh.f32 %v1234_v11  ;;  %v1745_v14 = vmul.f32 -1.442695, %v1234_v11 }
0x13f2   :  { %2063 = vpow2.f32 %v1745_v14  ;;  %v1491_v14 = vsub.s32 3, %v2603_v12 }
0x13fd   :  { %v2062_v13 = vpop.eup %2061 }
0x13fe   :  { %1247 = vrot.lane.b32.xlu1 %v2062_v13, %s2235_s0 }
0x13ff   :  { %v2064_v15 = vpop.eup %2063 }
0x1400   :  { %v1238_v16 = vadd.f32 1.0, %v2064_v15 }
0x1402   :  { %2065 = vrcp.f32 %v1238_v16 }
0x140f   :  { %v2066_v17 = vpop.eup %2065 }
0x1410   :  { %v1245_v21 = vmul.f32 %v2066_v17, %v1243_v20 }
0x1470   :  { %v1248_v18 = vpop.permute.xlu1 %1247 }
0x1471   :  { %v1250_v19 = vmul.f32 %v2066_v17, %v1248_v18 }
0x1473   :  { %1252 = vrot.lane.b32.xlu0 %v1250_v19, %s2236_s5 }
0x14e5   :  { %v1253_v22 = vpop.permute.xlu0 %1252 }
0x14e6   :  { %v1255_v23 = vadd.f32 %v1253_v22, %v1245_v21 }
0x14e8   :  { %2067 = vtanh.f32 %v1255_v23 }
0x14f5   :  { %v2068_v24 = vpop.eup %2067 }
0x14f6   :  { %1258 = vrot.lane.b32.xlu1 %v2068_v24, %s2235_s0 }
0x1568   :  { %v1259_v27 = vpop.permute.xlu1 %1258 }
0x1569   :  { %v1261_v9 = vmul.f32 %v2066_v17, %v1259_v27 }
0x156b   :  { %v1266_v28 = vrot.slane %v1261_v9, %v1265_v26  ;;  %v1269_v29 = vrot.slane %v1261_v9, 1 }
0x156d   :  { %v1267_v30 = vsel %vm1262_vm2, %v1266_v28, %v1155_v2  ;;  %1270 = vrot.lane.b32.xlu0 %v1269_v29, %s2236_s5 }
0x15df   :  { %v1271_v31 = vpop.permute.xlu0 %1270 }
0x15e0   :  { %1955 = vmatmul.mubr.msk.f32.vlgmr.msra.gmra.mxu1 %vm239_vm4, %v1271_v31 }
0x15e1   :  { %1969 = vmatpush3.msra.mxu1 %v2536_v6  ;;  %1976 = vmatprep.mubr.msk.f32.mxu1 %vm2233_vm0, %v2232_v0 }
0x15e2   :  { %1970 = vmatprep.subr.mxu1 %v2232_v0 }
0x15e3   :  { %1971 = vmatpush3.msra.mxu1 %v2541_v33 }
0x15e4   :  { %1972 = vmatprep.subr.mxu1 %v2232_v0 }
0x15e5   :  { %1973 = vmatpush3.msra.mxu1 %v2545_v7 }
0x15e6   :  { %1974 = vmatprep.subr.mxu1 %v2232_v0 }
0x15e7   :  { %1975 = vmatpush3.msra.mxu1 %v2549_v34  ;;  %v1356_v34 = vrot.slane %v1255_v23, 7 }
0x16a0   :  { %v1340_v32 = vpop.f32.mrf.mxu1 }
0x16a1   :  { %v1345_v5 = vrot.slane %v1340_v32, 6  ;;  %v1609_v32 = vld [vmem:[#allocation10 + $0x10] sm:$0xff] }
0x16a2   :  { %v1956_v35 = vpop.f32.mrf.mxu1 }
0x16a3   :  { %v1347_v6 = vadd.f32 %v1345_v5, %v2581_v48  ;;  %v1608_v5 = vld [vmem:[#allocation10 + $0x8] sm:$0xff]  ;;  %v1607_v35 = vld [vmem:[#allocation10] sm:$0xff] }
0x16a5   :  { %2069 = vtanh.f32 %v1347_v6  ;;  %v1747_v37 = vmul.f32 -1.442695, %v1347_v6 }
0x16a7   :  { %2071 = vpow2.f32 %v1747_v37 }
0x16b2   :  { %v2070_v36 = vpop.eup %2069 }
0x16b3   :  { %1360 = vrot.lane.b32.xlu1 %v2070_v36, %s2235_s0  ;;  %v1604_v36 = vsub.s32 4, %v2603_v12 }
0x16b4   :  { %v2072_v33 = vpop.eup %2071 }
0x16b5   :  { %v1351_v38 = vadd.f32 1.0, %v2072_v33 }
0x16b7   :  { %2073 = vrcp.f32 %v1351_v38 }
0x16c4   :  { %v2074_v39 = vpop.eup %2073 }
0x16c5   :  { %v1358_v43 = vmul.f32 %v2074_v39, %v1356_v34 }
0x1725   :  { %v1361_v7 = vpop.permute.xlu1 %1360 }
0x1726   :  { %v1363_v42 = vmul.f32 %v2074_v39, %v1361_v7 }
0x1728   :  { %1365 = vrot.lane.b32.xlu0 %v1363_v42, %s2236_s5 }
0x179a   :  { %v1366_v44 = vpop.permute.xlu0 %1365 }
0x179b   :  { %v1368_v45 = vadd.f32 %v1366_v44, %v1358_v43 }
0x179d   :  { %2075 = vtanh.f32 %v1368_v45  ;;  %v1469_v3 = vrot.slane %v1368_v45, 7 }
0x17aa   :  { %v2076_v46 = vpop.eup %2075 }
0x17ab   :  { %1371 = vrot.lane.b32.xlu1 %v2076_v46, %s2235_s0 }
0x181d   :  { %v1372_v49 = vpop.permute.xlu1 %1371 }
0x181e   :  { %v1374_v50 = vmul.f32 %v2074_v39, %v1372_v49 }
0x1820   :  { %v1379_v51 = vrot.slane %v1374_v50, %v1378_v47  ;;  %v1382_v52 = vrot.slane %v1374_v50, 2 }
0x1822   :  { %1383 = vrot.lane.b32.xlu0 %v1382_v52, %s2236_s5  ;;  %v1380_v53 = vsel %vm1375_vm3, %v1379_v51, %v1267_v30 }
0x1894   :  { %v1384_v54 = vpop.permute.xlu0 %1383 }
0x1895   :  { %1966 = vmatmul.mubr.msk.f32.vlgmr.msra.gmra.mxu0 %vm239_vm4, %v1384_v54 }
0x1896   :  { %1987 = vmatprep.mubr.msk.f32.mxu0 %vm2233_vm0, %v2232_v0  ;;  %vm1488_vm0 = vcmp.eq.s32.totalorder %v2603_v12, 3 }
0x1955   :  { %v1453_v55 = vpop.f32.mrf.mxu0 }
0x1956   :  { %v1458_v56 = vrot.slane %v1453_v55, 5 }
0x1957   :  { %v1967_v57 = vpop.f32.mrf.mxu0 }
0x1958   :  { %v1460_v58 = vadd.f32 %v1458_v56, %v2581_v48 }
0x195a   :  { %2077 = vtanh.f32 %v1460_v58  ;;  %v1749_v60 = vmul.f32 -1.442695, %v1460_v58 }
0x195c   :  { %2079 = vpow2.f32 %v1749_v60 }
0x1967   :  { %v2078_v59 = vpop.eup %2077 }
0x1968   :  { %1473 = vrot.lane.b32.xlu1 %v2078_v59, %s2235_s0 }
0x1969   :  { %v2080_v41 = vpop.eup %2079 }
0x196a   :  { %v1464_v61 = vadd.f32 1.0, %v2080_v41 }
0x196c   :  { %2081 = vrcp.f32 %v1464_v61 }
0x1979   :  { %v2082_v62 = vpop.eup %2081 }
0x197a   :  { %v1471_v4 = vmul.f32 %v2082_v62, %v1469_v3 }
0x19da   :  { %v1474_v63 = vpop.permute.xlu1 %1473 }
0x19db   :  { %v1476_v1 = vmul.f32 %v2082_v62, %v1474_v63 }
0x19dd   :  { %1478 = vrot.lane.b32.xlu0 %v1476_v1, %s2236_s5 }
0x1a4f   :  { %v1479_v10 = vpop.permute.xlu0 %1478 }
0x1a50   :  { %v1481_v11 = vadd.f32 %v1479_v10, %v1471_v4 }
0x1a52   :  { %2083 = vtanh.f32 %v1481_v11  ;;  %v1582_v29 = vrot.slane %v1481_v11, 7 }
0x1a5f   :  { %v2084_v13 = vpop.eup %2083 }
0x1a60   :  { %1484 = vrot.lane.b32.xlu1 %v2084_v13, %s2235_s0 }
0x1ad2   :  { %v1485_v15 = vpop.permute.xlu1 %1484 }
0x1ad3   :  { %v1487_v16 = vmul.f32 %v2082_v62, %v1485_v15 }
0x1ad5   :  { %v1492_v17 = vrot.slane %v1487_v16, %v1491_v14  ;;  %v1495_v18 = vrot.slane %v1487_v16, 3 }
0x1ad7   :  { %1496 = vrot.lane.b32.xlu0 %v1495_v18, %s2236_s5  ;;  %v1493_v19 = vsel %vm1488_vm0, %v1492_v17, %v1380_v53 }
0x1b49   :  { %v1497_v20 = vpop.permute.xlu0 %1496 }
0x1b4a   :  { %1977 = vmatmul.mubr.msk.f32.vlgmr.msra.gmra.mxu1 %vm239_vm4, %v1497_v20 }
0x1c0a   :  { %v1566_v21 = vpop.f32.mrf.mxu1 }
0x1c0b   :  { %v1571_v22 = vrot.slane %v1566_v21, 4 }
0x1c0c   :  { %v1978_v23 = vpop.f32.mrf.mxu1 }
0x1c0d   :  { %v1573_v24 = vadd.f32 %v1571_v22, %v2581_v48  ;;  %v1610_v48 = vld [vmem:[#allocation10 + $0x18] sm:$0xff] }
0x1c0e   :  { %1980 = vmatpush3.msra.mxu0 %v1610_v48 }
0x1c0f   :  { %2085 = vtanh.f32 %v1573_v24  ;;  %v1751_v40 = vmul.f32 -1.442695, %v1573_v24  ;;  %1981 = vmatprep.subr.mxu0 %v2232_v0 }
0x1c10   :  { %1982 = vmatpush3.msra.mxu0 %v1609_v32 }
0x1c11   :  { %2087 = vpow2.f32 %v1751_v40  ;;  %1983 = vmatprep.subr.mxu0 %v2232_v0 }
0x1c12   :  { %1984 = vmatpush3.msra.mxu0 %v1608_v5 }
0x1c13   :  { %1985 = vmatprep.subr.mxu0 %v2232_v0  ;;  %v1752_v0 = vld [vmem:[%s2666_s11] ss:$0 sm:$0xff]  ;;  %s2197_s11 = scalar_lea.vmem %s1712_s3, 128 }
0x1c14   :  { %1986 = vmatpush3.msra.mxu0 %v1607_v35  ;;  %p2198_p11 = scmp.ne.s32.totalorder %s1712_s3, %s2197_s11  ;;  %p2203_p13 = scmp.lt.s32.totalorder %s2197_s11, %s2197_s11 }
0x1c16   :  { %p2204_p0 = por %p2203_p13, %p2202_p12 }
0x1c18   :  { %p2205_p1 = pnand %p2204_p0, %p2198_p11 }
0x1c1c   :  { %v2086_v25 = vpop.eup %2085 }
0x1c1d   :  { %1586 = vrot.lane.b32.xlu1 %v2086_v25, %s2235_s0 }
0x1c1e   :  { %v2088_v26 = vpop.eup %2087 }
0x1c1f   :  { %v1577_v8 = vadd.f32 1.0, %v2088_v26 }
0x1c21   :  { %2089 = vrcp.f32 %v1577_v8 }
0x1c2e   :  { %v2090_v27 = vpop.eup %2089 }
0x1c2f   :  { %v1584_v2 = vmul.f32 %v2090_v27, %v1582_v29 }
0x1c8f   :  { %v1587_v9 = vpop.permute.xlu1 %1586 }
0x1c90   :  { %v1589_v28 = vmul.f32 %v2090_v27, %v1587_v9 }
0x1c92   :  { %1591 = vrot.lane.b32.xlu0 %v1589_v28, %s2236_s5 }
0x1d04   :  { %v1592_v30 = vpop.permute.xlu0 %1591 }
0x1d05   :  { %v1594_v31 = vadd.f32 %v1592_v30, %v1584_v2 }
0x1d07   :  { %2091 = vtanh.f32 %v1594_v31 }
0x1d14   :  { %v2092_v6 = vpop.eup %2091 }
0x1d15   :  { %1597 = vrot.lane.b32.xlu1 %v2092_v6, %s2235_s0 }
0x1d87   :  { %v1598_v37 = vpop.permute.xlu1 %1597 }
0x1d88   :  { %v1600_v33 = vmul.f32 %v2090_v27, %v1598_v37 }
0x1d8a   :  { %v1605_v38 = vrot.slane %v1600_v33, %v1604_v36 }
0x1d8c   :  { %v1606_v39 = vsel %vm1601_vm5, %v1605_v38, %v1493_v19 }
0x1d8d   :  { %1619 = vrot.lane.b32.xlu0 %v1606_v39, %s2236_s5 }
0x1dff   :  { %v1620_v7 = vpop.permute.xlu0 %1619 }
0x1e00   :  { %1988 = vmatmul.mubr.msk.f32.vlgmr.msra.gmra.mxu0 %vm239_vm4, %v1620_v7 }
0x1ec0   :  { %v1689_v42 = vpop.f32.mrf.mxu0 }
0x1ec1   :  { %v1690_v34 = vadd.f32 %v1752_v0, %v1689_v42 }
0x1ec2   :  { %v1989_v43 = vpop.f32.mrf.mxu0 }
0x1ec3   :  { %1693 = vmax.xlane.f32.xlu1 %v1690_v34 }
0x1f4c   :  { %v1694_v44 = vpop.xlane.xlu1 %1693 }
0x1f4d   :  { %v1695_v45 = vsub.f32 %v1690_v34, %v1694_v44 }
0x1f4f   :  { %v1696_v46 = vmul.f32 1.442695, %v1695_v45 }
0x1f51   :  { %2093 = vpow2.f32 %v1696_v46 }
0x1f5e   :  { %v2094_v12 = vpop.eup %2093 }
0x1f5f   :  { %1698 = vadd.xlane.f32.xlu0 %v2094_v12 }
0x1fe8   :  { %v1699_v47 = vpop.xlane.xlu0 %1698 }
0x1fe9   :  { %2095 = vlog2.f32 %v1699_v47 }
0x1ff6   :  { %v2096_v49 = vpop.eup %2095 }
0x1ff7   :  { %v1701_v50 = vmul.f32 0.6931472, %v2096_v49 }
0x1ff9   :  { %v1702_v51 = vadd.f32 %v1701_v50, %v1694_v44 }
0x1ffb   :  { %v1703_v52 = vsub.f32 %v1690_v34, %v1702_v51 }
0x1ffd   :  { %1704 = vst [vmem:[#allocation11] sm:$0xff] %v1703_v52 }
0x1ffe   :  { %2208 = shalt.err (!%p2205_p1)
}
0x1fff   :  { %1714 = dma.vmem_to_hbm [thread:$0]  %s1712_s3, 128, %s2667_s12, [#allocation4]  }
0x2000   :  { %2223 = dma.done.wait [#allocation4], 128  }
0x2001   :  { %2224 = vsyncadd [#allocation4], 4294967168 }
0x2002   :  { %1718 = vsyncpa [#allocation3], 1 }
0x2003   :  { %1719 = vsyncpa [#allocation6], 1 }
0x2004   :  { %1720 = vsyncpa [#allocation9], 1 }
0x2005   :  { %1721 = vsyncpa [#allocation4], 1 }

</bundles_post_ra>
